<compile_context>
chip_gen: v7x
topology: tpu7x:2x2x1
jax: 0.10.0
libtpu: 0.0.40
codegen_flags: <defaults>
</compile_context>

<pallas_src>
import functools
import math

import jax
import jax.numpy as jnp
from jax import lax
from jax.experimental import pallas as pl
from jax.experimental.pallas import tpu as pltpu

_EPS = 1e-12                         # F.normalize clamp_min epsilon
_FUSED_TABLE_VMEM_BUDGET = 4 * 1024 * 1024   # resident-table gather only below this
_INPUT_VMEM_BUDGET = 12 * 1024 * 1024        # 3 inputs x 2 pipeline buffers budget


def _round_up(x: int, m: int) -> int:
    return ((x + m - 1) // m) * m


# ----------------------- shared in-kernel scoring body ---------------------- #
def _transe_score_cols(h, r, t, p_norm):
    """TransE score for column-major tiles.

    h, r, t : (D, TB) f32 — hidden dim on sublanes, batch on lanes.
    returns : (1, TB) f32 negative p-norm score (lane-dense row).
    """
    if p_norm == 2:
        # F.normalize: x / clamp_min(||x||_2, eps)  ==  x * rsqrt(clamp_min(||x||^2, eps^2))
        h = h * lax.rsqrt(jnp.maximum(jnp.sum(h * h, axis=0, keepdims=True), _EPS * _EPS))
        t = t * lax.rsqrt(jnp.maximum(jnp.sum(t * t, axis=0, keepdims=True), _EPS * _EPS))
        d = (h + r) - t
        return -jnp.sqrt(jnp.sum(d * d, axis=0, keepdims=True))
    elif p_norm == 1:
        h = h * (1.0 / jnp.maximum(jnp.sum(jnp.abs(h), axis=0, keepdims=True), _EPS))
        t = t * (1.0 / jnp.maximum(jnp.sum(jnp.abs(t), axis=0, keepdims=True), _EPS))
        d = (h + r) - t
        return -jnp.sum(jnp.abs(d), axis=0, keepdims=True)
    else:
        p = int(p_norm)

        def pnorm(x):
            a = jnp.abs(x)
            ap = a
            for _ in range(p - 1):          # integer powers on the VALU, not EUP pow
                ap = ap * a
            return jnp.power(jnp.sum(ap, axis=0, keepdims=True), 1.0 / p)

        h = h * (1.0 / jnp.maximum(pnorm(h), _EPS))
        t = t * (1.0 / jnp.maximum(pnorm(t), _EPS))
        return -pnorm((h + r) - t)


# ------------------------------ Pallas kernels ------------------------------ #
def _transe_fused_kernel(hidx_ref, ridx_ref, tidx_ref, node_t_ref, rel_t_ref,
                         out_ref, *, p_norm):
    """Fused gather + score.

    hidx/ridx/tidx : (1, TB) int32 lane-dense index rows.
    node_t_ref     : (Dp, Np) f32 — full node table (transposed, padded), VMEM resident.
    rel_t_ref      : (Dp, Rp) f32 — full relation table (transposed, padded), VMEM resident.
    out_ref        : (1, TB) f32 scores.
    """
    tb = out_ref.shape[-1]
    node_t = node_t_ref[...]
    rel_t = rel_t_ref[...]

    def gather_cols(table_t, idx_row):
        n = table_t.shape[-1]
        row_ids = lax.broadcasted_iota(jnp.int32, (n, tb), 0)
        onehot = jnp.where(row_ids == idx_row, 1.0, 0.0).astype(jnp.float32)
        # Row gather expressed as a matmul -> runs on the otherwise-idle MXU.
        return jnp.dot(table_t, onehot,
                       precision=lax.Precision.HIGHEST,
                       preferred_element_type=jnp.float32)      # (Dp, TB)

    h = gather_cols(node_t, hidx_ref[...])
    r = gather_cols(rel_t, ridx_ref[...])
    t = gather_cols(node_t, tidx_ref[...])
    out_ref[...] = _transe_score_cols(h, r, t, p_norm)


def _transe_pregathered_kernel(h_ref, r_ref, t_ref, out_ref, *, p_norm):
    """Score-only kernel: h/r/t are (D, TB) pre-gathered tiles, out is (1, TB)."""
    out_ref[...] = _transe_score_cols(h_ref[...].astype(jnp.float32),
                                      r_ref[...].astype(jnp.float32),
                                      t_ref[...].astype(jnp.float32),
                                      p_norm)


# --------------------------------- wrapper ----------------------------------- #
def _choose_tile(B: int, D: int, batch_tile: int) -> int:
    """Lane-dense (multiple of 128) batch tile, capped by a VMEM budget."""
    cap = max(128, (_INPUT_VMEM_BUDGET // (3 * 2 * max(D, 1) * 4)) // 128 * 128)
    tb_req = max(128, (int(batch_tile) // 128) * 128)
    tb = min(tb_req, _round_up(B, 128), cap)
    # Prefer >= 2 grid steps so both v7x TensorCores get work.
    if B > 128 and _round_up(B, tb) // tb < 2:
        tb = min(tb, max(128, _round_up(pl.cdiv(B, 2), 128)))
    return tb


def transe_forward(batched_paths, node_emb, rel_emb, *, p_norm: int = 2,
                   batch_tile: int = 512, fuse_gather=None):
    """Equivalent of KGEModelProxy.forward for model_name='transe' (default cfg)."""
    heads = batched_paths[:, -1].astype(jnp.int32)
    rels = batched_paths[:, -2].astype(jnp.int32)
    tails = batched_paths[:, 0].astype(jnp.int32)

    B = heads.shape[0]
    N, D = node_emb.shape
    R = rel_emb.shape[0]

    tb = _choose_tile(B, D, batch_tile)
    Bp = _round_up(B, tb)
    pad = Bp - B
    grid = (Bp // tb,)

    Dp = _round_up(D, 8)
    Np = _round_up(N, 128)
    Rp = _round_up(R, 128)
    if fuse_gather is None:
        fuse_gather = (Np + Rp) * Dp * 4 <= _FUSED_TABLE_VMEM_BUDGET

    out_shape = jax.ShapeDtypeStruct((1, Bp), jnp.float32)
    out_spec = pl.BlockSpec((1, tb), lambda i: (0, i))
    params = pltpu.CompilerParams(dimension_semantics=("parallel",))

    if fuse_gather:
        # Tables resident in VMEM (transposed + padded to aligned MXU shapes);
        # indices streamed as lane-dense int32 rows. Padded batch rows gather
        # row 0 and are sliced off below.
        node_t = jnp.zeros((Dp, Np), jnp.float32).at[:D, :N].set(
            node_emb.astype(jnp.float32).T)
        rel_t = jnp.zeros((Dp, Rp), jnp.float32).at[:D, :R].set(
            rel_emb.astype(jnp.float32).T)
        hidx = jnp.pad(heads, (0, pad)).reshape(1, Bp)
        ridx = jnp.pad(rels, (0, pad)).reshape(1, Bp)
        tidx = jnp.pad(tails, (0, pad)).reshape(1, Bp)

        idx_spec = pl.BlockSpec((1, tb), lambda i: (0, i))
        out = pl.pallas_call(
            functools.partial(_transe_fused_kernel, p_norm=p_norm),
            out_shape=out_shape,
            grid=grid,
            in_specs=[idx_spec, idx_spec, idx_spec,
                      pl.BlockSpec((Dp, Np), lambda i: (0, 0)),
                      pl.BlockSpec((Dp, Rp), lambda i: (0, 0))],
            out_specs=out_spec,
            compiler_params=params,
        )(hidx, ridx, tidx, node_t, rel_t)
    else:
        # TODO(synk): for huge tables the gather could also be fused via
        # scalar-prefetched indices + manual row DMAs (memory_space=pl.ANY) to
        # avoid the extra HBM round-trip of these materialized (D, B) arrays.
        def gather_cols(table, idx):
            g = jnp.take(table, idx, axis=0).astype(jnp.float32).T   # (D, B)
            return jnp.pad(g, ((0, 0), (0, pad)))

        h = gather_cols(node_emb, heads)
        r = gather_cols(rel_emb, rels)
        t = gather_cols(node_emb, tails)

        in_spec = pl.BlockSpec((D, tb), lambda i: (0, i))
        out = pl.pallas_call(
            functools.partial(_transe_pregathered_kernel, p_norm=p_norm),
            out_shape=out_shape,
            grid=grid,
            in_specs=[in_spec, in_spec, in_spec],
            out_specs=out_spec,
            compiler_params=params,
        )(h, r, t)

    return out[0, :B]


# ----------------------------- reference (pure JAX) -------------------------- #
def transe_forward_ref(batched_paths, node_emb, rel_emb, p_norm: int = 2):
    heads = batched_paths[:, -1]
    rels = batched_paths[:, -2]
    tails = batched_paths[:, 0]
    h = jnp.take(node_emb, heads, axis=0).astype(jnp.float32)
    r = jnp.take(rel_emb, rels, axis=0).astype(jnp.float32)
    t = jnp.take(node_emb, tails, axis=0).astype(jnp.float32)

    def pnorm(x):
        return jnp.power(jnp.sum(jnp.power(jnp.abs(x), p_norm), axis=-1), 1.0 / p_norm)

    h = h / jnp.maximum(pnorm(h), _EPS)[:, None]
    t = t / jnp.maximum(pnorm(t), _EPS)[:, None]
    return -pnorm((h + r) - t)


# ------------------------------------ main ----------------------------------- #
if __name__ == "__main__":
    # cfg analogue (model_name='transe' defaults): p_norm=2, margin unused in forward.
    num_nodes = 64
    num_relations = 4
    hidden_channels = 32
    p_norm = 2
    batch = 16
    path_len = 4   # forward uses columns [0] (tails), [-2] (rels), [-1] (heads)

    key = jax.random.PRNGKey(0)
    k_node, k_rel, k_nodes_idx, k_rel_idx = jax.random.split(key, 4)

    # Deterministic parameter init (mirrors TransE.reset_parameters shapes).
    bound = 6.0 / math.sqrt(hidden_channels)
    node_emb = jax.random.uniform(
        k_node, (num_nodes, hidden_channels), jnp.float32, -bound, bound)
    rel_emb = jax.random.uniform(
        k_rel, (num_relations, hidden_channels), jnp.float32, -bound, bound)
    rel_emb = rel_emb / jnp.maximum(
        jnp.linalg.norm(rel_emb, ord=p_norm, axis=-1, keepdims=True), _EPS)

    # Synthetic batched_paths (int32 indices).
    node_cols = jax.random.randint(
        k_nodes_idx, (batch, path_len), 0, num_nodes, dtype=jnp.int32)
    rel_col = jax.random.randint(
        k_rel_idx, (batch,), 0, num_relations, dtype=jnp.int32)
    batched_paths = node_cols.at[:, -2].set(rel_col)

    # TODO(synk): only the 'transe' branch (default cfg) is implemented; the
    # distmult/complex/rotate scoring variants are not ported here.

    ref = transe_forward_ref(batched_paths, node_emb, rel_emb, p_norm=p_norm)

    # Fused-gather path (tables resident in VMEM, gather on the MXU).
    scores_fused = jax.block_until_ready(
        transe_forward(batched_paths, node_emb, rel_emb, p_norm=p_norm,
                       fuse_gather=True))
    # Pre-gathered fallback path (XLA gather in the wrapper, kernel scores only).
    scores_pre = jax.block_until_ready(
        transe_forward(batched_paths, node_emb, rel_emb, p_norm=p_norm,
                       fuse_gather=False))

    assert scores_fused.shape == (batch,)
    assert scores_pre.shape == (batch,)
    assert jnp.allclose(scores_fused, ref, atol=1e-4, rtol=1e-4), (scores_fused, ref)
    assert jnp.allclose(scores_pre, ref, atol=1e-4, rtol=1e-4), (scores_pre, ref)

    print("KERNEL_OK")
</pallas_src>

<mosaic_0001>
module attributes {stable_mosaic.version = 11 : i64} {
  func.func @_transe_fused_kernel(%arg0: i32, %arg1: memref<1x128xi32, #tpu.memory_space<vmem>>, %arg2: memref<1x128xi32, #tpu.memory_space<vmem>>, %arg3: memref<1x128xi32, #tpu.memory_space<vmem>>, %arg4: memref<32x128xf32, #tpu.memory_space<vmem>>, %arg5: memref<32x128xf32, #tpu.memory_space<vmem>>, %arg6: memref<1x128xf32, #tpu.memory_space<vmem>>) attributes {dimension_semantics = [#tpu.dimension_semantics<parallel>], iteration_bounds = array<i64: 1>, scalar_prefetch = 0 : i64, scratch_operands = 0 : i64, tpu.core_type = #tpu.core_type<tc>, window_params = [{transform_indices = @transform_0, window_bounds = array<i64: 1, 128>}, {transform_indices = @transform_1, window_bounds = array<i64: 1, 128>}, {transform_indices = @transform_2, window_bounds = array<i64: 1, 128>}, {pipeline_mode = #tpu.pipeline_mode<synchronous>, transform_indices = @transform_3, window_bounds = array<i64: 32, 128>}, {pipeline_mode = #tpu.pipeline_mode<synchronous>, transform_indices = @transform_4, window_bounds = array<i64: 32, 128>}, {transform_indices = @transform_5, window_bounds = array<i64: 1, 128>}]} {
    %c0 = arith.constant 0 : index
    %c0_0 = arith.constant 0 : index
    %0 = vector.load %arg4[%c0, %c0_0] : memref<32x128xf32, #tpu.memory_space<vmem>>, vector<32x128xf32>
    %c0_1 = arith.constant 0 : index
    %c0_2 = arith.constant 0 : index
    %1 = vector.load %arg5[%c0_1, %c0_2] : memref<32x128xf32, #tpu.memory_space<vmem>>, vector<32x128xf32>
    %c0_3 = arith.constant 0 : index
    %c0_4 = arith.constant 0 : index
    %2 = vector.load %arg1[%c0_3, %c0_4] : memref<1x128xi32, #tpu.memory_space<vmem>>, vector<1x128xi32>
    %3 = tpu.iota {dimensions = array<i32: 0>} : vector<128x128xi32>
    %4 = vector.broadcast %2 : vector<1x128xi32> to vector<128x128xi32>
    %5 = arith.cmpi eq, %3, %4 : vector<128x128xi32>
    %cst = arith.constant 1.000000e+00 : f32
    %cst_5 = arith.constant 0.000000e+00 : f32
    %6 = vector.broadcast %cst : f32 to vector<128x128xf32>
    %7 = vector.broadcast %cst_5 : f32 to vector<128x128xf32>
    %8 = arith.select %5, %6, %7 : vector<128x128xi1>, vector<128x128xf32>
    %cst_6 = arith.constant dense<0.000000e+00> : vector<32x128xf32>
    %9 = tpu.matmul %0, %8, %cst_6 {dimension_numbers = #tpu.dot_dimension_numbers<[1], [0], [0], [1], [0, 0, 1, 1], [], []>, precision = #tpu.contract_precision<fp32>} : vector<32x128xf32>, vector<128x128xf32>, vector<32x128xf32> -> vector<32x128xf32>
    %c0_7 = arith.constant 0 : index
    %c0_8 = arith.constant 0 : index
    %10 = vector.load %arg2[%c0_7, %c0_8] : memref<1x128xi32, #tpu.memory_space<vmem>>, vector<1x128xi32>
    %11 = tpu.iota {dimensions = array<i32: 0>} : vector<128x128xi32>
    %12 = vector.broadcast %10 : vector<1x128xi32> to vector<128x128xi32>
    %13 = arith.cmpi eq, %11, %12 : vector<128x128xi32>
    %cst_9 = arith.constant 1.000000e+00 : f32
    %cst_10 = arith.constant 0.000000e+00 : f32
    %14 = vector.broadcast %cst_9 : f32 to vector<128x128xf32>
    %15 = vector.broadcast %cst_10 : f32 to vector<128x128xf32>
    %16 = arith.select %13, %14, %15 : vector<128x128xi1>, vector<128x128xf32>
    %cst_11 = arith.constant dense<0.000000e+00> : vector<32x128xf32>
    %17 = tpu.matmul %1, %16, %cst_11 {dimension_numbers = #tpu.dot_dimension_numbers<[1], [0], [0], [1], [0, 0, 1, 1], [], []>, precision = #tpu.contract_precision<fp32>} : vector<32x128xf32>, vector<128x128xf32>, vector<32x128xf32> -> vector<32x128xf32>
    %c0_12 = arith.constant 0 : index
    %c0_13 = arith.constant 0 : index
    %18 = vector.load %arg3[%c0_12, %c0_13] : memref<1x128xi32, #tpu.memory_space<vmem>>, vector<1x128xi32>
    %19 = tpu.iota {dimensions = array<i32: 0>} : vector<128x128xi32>
    %20 = vector.broadcast %18 : vector<1x128xi32> to vector<128x128xi32>
    %21 = arith.cmpi eq, %19, %20 : vector<128x128xi32>
    %cst_14 = arith.constant 1.000000e+00 : f32
    %cst_15 = arith.constant 0.000000e+00 : f32
    %22 = vector.broadcast %cst_14 : f32 to vector<128x128xf32>
    %23 = vector.broadcast %cst_15 : f32 to vector<128x128xf32>
    %24 = arith.select %21, %22, %23 : vector<128x128xi1>, vector<128x128xf32>
    %cst_16 = arith.constant dense<0.000000e+00> : vector<32x128xf32>
    %25 = tpu.matmul %0, %24, %cst_16 {dimension_numbers = #tpu.dot_dimension_numbers<[1], [0], [0], [1], [0, 0, 1, 1], [], []>, precision = #tpu.contract_precision<fp32>} : vector<32x128xf32>, vector<128x128xf32>, vector<32x128xf32> -> vector<32x128xf32>
    %26 = arith.mulf %9, %9 : vector<32x128xf32>
    %cst_17 = arith.constant dense<0.000000e+00> : vector<128xf32>
    %27 = vector.multi_reduction <add>, %26, %cst_17 [0] : vector<32x128xf32> to vector<128xf32>
    %28 = vector.shape_cast %27 : vector<128xf32> to vector<1x128xf32>
    %cst_18 = arith.constant 1.000000e-24 : f32
    %29 = vector.broadcast %cst_18 : f32 to vector<1x128xf32>
    %30 = arith.maximumf %28, %29 : vector<1x128xf32>
    %31 = math.rsqrt %30 : vector<1x128xf32>
    %32 = vector.broadcast %31 : vector<1x128xf32> to vector<32x128xf32>
    %33 = arith.mulf %9, %32 : vector<32x128xf32>
    %34 = arith.mulf %25, %25 : vector<32x128xf32>
    %cst_19 = arith.constant dense<0.000000e+00> : vector<128xf32>
    %35 = vector.multi_reduction <add>, %34, %cst_19 [0] : vector<32x128xf32> to vector<128xf32>
    %36 = vector.shape_cast %35 : vector<128xf32> to vector<1x128xf32>
    %cst_20 = arith.constant 1.000000e-24 : f32
    %37 = vector.broadcast %cst_20 : f32 to vector<1x128xf32>
    %38 = arith.maximumf %36, %37 : vector<1x128xf32>
    %39 = math.rsqrt %38 : vector<1x128xf32>
    %40 = vector.broadcast %39 : vector<1x128xf32> to vector<32x128xf32>
    %41 = arith.mulf %25, %40 : vector<32x128xf32>
    %42 = arith.addf %33, %17 : vector<32x128xf32>
    %43 = arith.subf %42, %41 : vector<32x128xf32>
    %44 = arith.mulf %43, %43 : vector<32x128xf32>
    %cst_21 = arith.constant dense<0.000000e+00> : vector<128xf32>
    %45 = vector.multi_reduction <add>, %44, %cst_21 [0] : vector<32x128xf32> to vector<128xf32>
    %46 = vector.shape_cast %45 : vector<128xf32> to vector<1x128xf32>
    %47 = math.sqrt %46 : vector<1x128xf32>
    %cst_22 = arith.constant 0.000000e+00 : f32
    %48 = vector.broadcast %cst_22 : f32 to vector<1x128xf32>
    %49 = arith.subf %48, %47 : vector<1x128xf32>
    %c0_23 = arith.constant 0 : index
    %c0_24 = arith.constant 0 : index
    %50 = vector.load %arg6[%c0_23, %c0_24] : memref<1x128xf32, #tpu.memory_space<vmem>>, vector<1x128xf32>
    tpu.vector_store %arg6[%c0_23, %c0_24], %49 {strides = array<i32>} : memref<1x128xf32, #tpu.memory_space<vmem>>, vector<1x128xf32>,
    return
  }
  func.func @transform_0(%arg0: i32) -> (i32, i32) {
    %c0_i32 = arith.constant 0 : i32
    %c0_i32_0 = arith.constant 0 : i32
    return %c0_i32, %arg0 : i32, i32
  }
  func.func @transform_1(%arg0: i32) -> (i32, i32) {
    %c0_i32 = arith.constant 0 : i32
    %c0_i32_0 = arith.constant 0 : i32
    return %c0_i32, %arg0 : i32, i32
  }
  func.func @transform_2(%arg0: i32) -> (i32, i32) {
    %c0_i32 = arith.constant 0 : i32
    %c0_i32_0 = arith.constant 0 : i32
    return %c0_i32, %arg0 : i32, i32
  }
  func.func @transform_3(%arg0: i32) -> (i32, i32) {
    %c0_i32 = arith.constant 0 : i32
    %c0_i32_0 = arith.constant 0 : i32
    %c0_i32_1 = arith.constant 0 : i32
    return %c0_i32, %c0_i32_0 : i32, i32
  }
  func.func @transform_4(%arg0: i32) -> (i32, i32) {
    %c0_i32 = arith.constant 0 : i32
    %c0_i32_0 = arith.constant 0 : i32
    %c0_i32_1 = arith.constant 0 : i32
    return %c0_i32, %c0_i32_0 : i32, i32
  }
  func.func @transform_5(%arg0: i32) -> (i32, i32) {
    %c0_i32 = arith.constant 0 : i32
    %c0_i32_0 = arith.constant 0 : i32
    return %c0_i32, %arg0 : i32, i32
  }
}

</mosaic_0001>

<bundles_post_ra>
// kernel: tpu_custom_call.1
= control target key start
LH: loop header
LB: loop body
LE: loop exit
PB: predicated region body
PF: predicated region fallthrough
CT: control target
= control target key end

     0   :  { %10 = vsyncpa [#allocation3], 0  ;;  %s5944_s0 = inlined_call_operand.hbm [shape: s32[1,128], index: 0, kind: input, shape index: {}]   ;;  %s5945_s1 = inlined_call_operand.vmem [shape: s32[1,128], index: 1, kind: input, shape index: {}]   ;;  %s5946_s2 = inlined_call_operand.vmem [shape: s32[1,128], index: 2, kind: input, shape index: {}]   ;;  %s5947_s3 = inlined_call_operand.hbm [shape: f32[32,128], index: 3, kind: input, shape index: {}]   ;;  %s5948_s4 = inlined_call_operand.hbm [shape: f32[32,128], index: 4, kind: input, shape index: {}]   ;;  %s5949_s5 = inlined_call_operand.hbm [shape: f32[1,128], index: 5, kind: output, shape index: {}]  }
   0x1   :  { %11 = vsyncpa [#allocation6], 0 }
   0x2   :  { %12 = vsyncpa [#allocation4], 0  ;;  %s4237_s18 = smov [#allocation5]   ;;  %s4143_s22 = scalar_lea.hbm %s5947_s3, 512 }
   0x3   :  { %s32_s19 = sshll.u32 %s4237_s18, 4  ;;  %p4144_p0 = scmp.ne.s32.totalorder %s5947_s3, %s4143_s22  ;;  %s33_s19 = int_to_ptr.vmem [resolvable:$true] %s32_s19 }
   0x4   :  { %p4147_p1 = scmp.lt.u32.totalorder %s4143_s22, %s5947_s3 }
   0x6   :  { %p4149_p2 = pnand %p4147_p1, %p4144_p0 }
   0x8   :  { %4152 = shalt.err (!%p4149_p2)
}
   0x9   :  { %s4153_s27 = scalar_lea.vmem %s33_s19, 512  ;;  %p4158_p4 = scmp.lt.s32.totalorder %s33_s19, %s33_s19 }
   0xa   :  { %p4154_p3 = scmp.ne.s32.totalorder %s33_s19, %s4153_s27  ;;  %p4159_p5 = scmp.lt.s32.totalorder %s4153_s27, %s4153_s27 }
   0xc   :  { %p4160_p6 = por %p4159_p5, %p4158_p4 }
   0xe   :  { %p4161_p7 = pnand %p4160_p6, %p4154_p3 }
  0x10   :  { %4164 = shalt.err (!%p4161_p7)
}
  0x11   :  { %s4238_s28 = smov 128   ;;  %s4239_s29 = smov 8  }
  0x12   :  { %38 = dma.hbm_to_vmem [thread:$0]  %s5947_s3, 512, %s33_s19, [#allocation6], %s4238_s28, %s4238_s28, %s4239_s29  }
  0x13   :  { %s4240_s7 = smov [#allocation2]   ;;  %s4241_s9 = smov [#allocation7]  }
  0x14   :  { %s19_s8 = sshll.u32 %s4240_s7, 4  ;;  %s44_s10 = sshll.u32 %s4241_s9, 4  ;;  %s20_s8 = int_to_ptr.vmem [resolvable:$true] %s19_s8  ;;  %s45_s10 = int_to_ptr.vmem [resolvable:$true] %s44_s10 }
  0x15   :  { %s4165_s13 = scalar_lea.hbm %s5944_s0, 16 }
  0x16   :  { %p4166_p8 = scmp.ne.s32.totalorder %s5944_s0, %s4165_s13  ;;  %p4169_p9 = scmp.lt.u32.totalorder %s4165_s13, %s5944_s0 }
  0x18   :  { %p4171_p10 = pnand %p4169_p9, %p4166_p8 }
  0x1a   :  { %4174 = shalt.err (!%p4171_p10)
}
  0x1b   :  { %s4175_s3 = scalar_lea.vmem %s20_s8, 16  ;;  %s4179_s18 = scalar_lea.vmem %s20_s8, 32 }
  0x1c   :  { %p4176_p11 = scmp.ne.s32.totalorder %s20_s8, %s4175_s3  ;;  %p4180_p12 = scmp.lt.s32.totalorder %s20_s8, %s20_s8 }
  0x1d   :  { %p4181_p13 = scmp.lt.s32.totalorder %s4179_s18, %s4175_s3 }
  0x1f   :  { %p4182_p0 = por %p4181_p13, %p4180_p12 }
  0x21   :  { %p4183_p1 = pnand %p4182_p0, %p4176_p11 }
  0x23   :  { %4186 = shalt.err (!%p4183_p1)
}
  0x24   :  { %22 = dma.hbm_to_vmem [thread:$0]  %s5944_s0, 16, %s20_s8, [#allocation3]  }
  0x25   :  { %s4187_s23 = scalar_lea.hbm %s5948_s4, 512 }
  0x26   :  { %p4188_p2 = scmp.ne.s32.totalorder %s5948_s4, %s4187_s23  ;;  %p4191_p3 = scmp.lt.u32.totalorder %s4187_s23, %s5948_s4 }
  0x28   :  { %p4193_p4 = pnand %p4191_p3, %p4188_p2 }
  0x2a   :  { %4196 = shalt.err (!%p4193_p4)
}
  0x2b   :  { %s4197_s30 = scalar_lea.vmem %s45_s10, 512  ;;  %p4202_p6 = scmp.lt.s32.totalorder %s45_s10, %s45_s10 }
  0x2c   :  { %p4198_p5 = scmp.ne.s32.totalorder %s45_s10, %s4197_s30  ;;  %p4203_p7 = scmp.lt.s32.totalorder %s4197_s30, %s4197_s30 }
  0x2e   :  { %p4204_p8 = por %p4203_p7, %p4202_p6 }
  0x30   :  { %p4205_p9 = pnand %p4204_p8, %p4198_p5 }
  0x32   :  { %4208 = shalt.err (!%p4205_p9)
}
  0x33   :  { %50 = dma.hbm_to_vmem [thread:$0]  %s5948_s4, 512, %s45_s10, [#allocation6], %s4238_s28, %s4238_s28, %s4239_s29  }
  0x34   :  { %4231 = dma.done.wait [#allocation3], 16  }
  0x35   :  { %4232 = vsyncadd [#allocation3], 4294967280 }
  0x36   :  { %4233 = dma.done.wait [#allocation6], 1024  }
  0x37   :  { %4234 = vsyncadd [#allocation6], 4294966272  ;;  %v69_v0 = vlaneseq  ;;  %v4328_v5 = vld [vmem:[#allocation2] ss:$0 sm:$0xff]  ;;  %v5950_v10 = vmov 0.0   ;;  %v6102_v13 = vmov 0 }
  0x38   :  { %v5952_v16 = vmov 1.0|1.0   ;;  %v6107_v17 = vmov 0  ;;  %v6116_v30 = vmov 0  ;;  %v60_v31 = vld [vmem:[#allocation5] sm:$0xff]  ;;  %v61_v32 = vld [vmem:[#allocation5 + $0x8] sm:$0xff] }
  0x39   :  { %v4317_v1 = vshrl.u32 %v69_v0, 7  ;;  %v4476_v40 = vand.u32 4294901760, %v60_v31  ;;  %v4478_v41 = vand.u32 4294901760, %v61_v32  ;;  %v6121_v44 = vmov 0 }
  0x3a   :  { %v6125_v55 = vmov 0 }
  0x3b   :  { %v4320_v2 = vadd.s32 8, %v4317_v1  ;;  %v4323_v3 = vadd.s32 16, %v4317_v1  ;;  %v4326_v4 = vadd.s32 24, %v4317_v1  ;;  %v4331_v6 = vadd.s32 32, %v4317_v1  ;;  %6119 = vst [vmem:[#allocation23_spill] sm:$0xff] %v4476_v40  ;;  %6120 = vst [vmem:[#allocation24_spill] sm:$0xff] %v4478_v41 }
  0x3c   :  { %v4334_v7 = vadd.s32 40, %v4317_v1  ;;  %v4337_v8 = vadd.s32 48, %v4317_v1  ;;  %v4340_v9 = vadd.s32 56, %v4317_v1  ;;  %vm90_vm0 = vcmp.eq.s32.totalorder %v4317_v1, %v4328_v5 }
  0x3d   :  { %vm91_vm1 = vcmp.eq.s32.totalorder %v4320_v2, %v4328_v5  ;;  %vm92_vm2 = vcmp.eq.s32.totalorder %v4323_v3, %v4328_v5  ;;  %vm93_vm3 = vcmp.eq.s32.totalorder %v4326_v4, %v4328_v5  ;;  %v106_v11 = vsel %vm90_vm0, 1.0, %v5950_v10 }
  0x3e   :  { %v107_v12 = vsel %vm91_vm1, 1.0, %v5950_v10  ;;  %vm4352_vm4 = vmpackc.low %vm91_vm1, %vm90_vm0  ;;  %v4357_v14 = vadd.s32 64, %v4317_v1  ;;  %v4360_v15 = vadd.s32 72, %v4317_v1  ;;  %v4379_v18 = vadd.s32 80, %v4317_v1 }
  0x3f   :  { %v6103_v13 = vsel %vm4352_vm4, 4294967295, %v6102_v13  ;;  %3494 = vmatprep.subr.msk.bf16.mxu1 %vm4352_vm4, %v5952_v16  ;;  %3590 = vmatprep.subr.msk.bf16.mxu0 %vm4352_vm4, %v5952_v16  ;;  %vm4374_vm5 = vmpackc.low %vm93_vm3, %vm92_vm2  ;;  %v4382_v19 = vadd.s32 88, %v4317_v1  ;;  %v4385_v20 = vadd.s32 96, %v4317_v1  ;;  %v4388_v21 = vadd.s32 104, %v4317_v1 }
  0x40   :  { %6104 = vst [vmem:[#allocation12_spill] sm:$0xff] %v6103_v13  ;;  %6105 = vst [vmem:[#allocation13_spill] sm:$0xff] %v4357_v14  ;;  %v6108_v17 = vsel %vm4374_vm5, 4294967295, %v6107_v17  ;;  %3496 = vmatpush3.bf16.msk.msra.mxu1 %vm4352_vm4, %v5952_v16  ;;  %3592 = vmatpush3.bf16.msk.msra.mxu0 %vm4352_vm4, %v5952_v16  ;;  %vm94_vm6 = vcmp.eq.s32.totalorder %v4331_v6, %v4328_v5  ;;  %vm95_vm7 = vcmp.eq.s32.totalorder %v4334_v7, %v4328_v5 }
  0x41   :  { %6106 = vst [vmem:[#allocation14_spill] sm:$0xff] %v4360_v15  ;;  %6109 = vst [vmem:[#allocation15_spill] sm:$0xff] %v6108_v17  ;;  %v4401_v22 = vadd.s32 112, %v4317_v1  ;;  %v4404_v23 = vadd.s32 120, %v4317_v1  ;;  %v4406_v24 = vsub.f32 %v106_v11, %v106_v11  ;;  %v4408_v25 = vsub.f32 %v107_v12, %v107_v12  ;;  %3498 = vmatprep.subr.msk.bf16.mxu1 %vm4374_vm5, %v5952_v16 }
  0x42   :  { %6110 = vst [vmem:[#allocation16_spill] sm:$0xff] %v4379_v18  ;;  %6111 = vst [vmem:[#allocation17_spill] sm:$0xff] %v4382_v19  ;;  %v108_v26 = vsel %vm92_vm2, 1.0, %v5950_v10  ;;  %v109_v27 = vsel %vm93_vm3, 1.0, %v5950_v10  ;;  %3594 = vmatprep.subr.msk.bf16.mxu0 %vm4374_vm5, %v5952_v16  ;;  %v110_v28 = vsel %vm94_vm6, 1.0, %v5950_v10  ;;  %v111_v29 = vsel %vm95_vm7, 1.0, %v5950_v10 }
  0x43   :  { %6112 = vst [vmem:[#allocation18_spill] sm:$0xff] %v4385_v20  ;;  %6113 = vst [vmem:[#allocation19_spill] sm:$0xff] %v4388_v21  ;;  %vm96_vm9 = vcmp.eq.s32.totalorder %v4337_v8, %v4328_v5  ;;  %vm97_vm10 = vcmp.eq.s32.totalorder %v4340_v9, %v4328_v5  ;;  %vm98_vm11 = vcmp.eq.s32.totalorder %v4357_v14, %v4328_v5  ;;  %v229_v54 = vand.u32 4294901760, %v4406_v24 }
  0x44   :  { %6114 = vst [vmem:[#allocation20_spill] sm:$0xff] %v4401_v22  ;;  %6115 = vst [vmem:[#allocation21_spill] sm:$0xff] %v4404_v23  ;;  %v112_v33 = vsel %vm96_vm9, 1.0, %v5950_v10  ;;  %v113_v34 = vsel %vm97_vm10, 1.0, %v5950_v10  ;;  %vm99_vm12 = vcmp.eq.s32.totalorder %v4360_v15, %v4328_v5  ;;  %v4446_v35 = vsub.f32 %v108_v26, %v108_v26  ;;  %3500 = vmatpush3.bf16.msk.msra.mxu1 %vm4374_vm5, %v5952_v16 }
  0x45   :  { %vm4426_vm8 = vmpackc.low %vm95_vm7, %vm94_vm6  ;;  %3596 = vmatpush3.bf16.msk.msra.mxu0 %vm4374_vm5, %v5952_v16  ;;  %v114_v36 = vsel %vm98_vm11, 1.0, %v5950_v10  ;;  %v115_v37 = vsel %vm99_vm12, 1.0, %v5950_v10  ;;  %vm100_vm13 = vcmp.eq.s32.totalorder %v4379_v18, %v4328_v5  ;;  %v4464_v38 = vsub.f32 %v109_v27, %v109_v27 }
  0x46   :  { %v6117_v30 = vsel %vm4426_vm8, 4294967295, %v6116_v30  ;;  %3502 = vmatprep.subr.msk.bf16.mxu1 %vm4426_vm8, %v5952_v16  ;;  %3598 = vmatprep.subr.msk.bf16.mxu0 %vm4426_vm8, %v5952_v16  ;;  %v116_v39 = vsel %vm100_vm13, 1.0, %v5950_v10  ;;  %v4480_v42 = vsub.f32 %v110_v28, %v110_v28  ;;  %v4482_v43 = vsub.f32 %v111_v29, %v111_v29  ;;  %vm4490_vm14 = vmpackc.low %vm97_vm10, %vm96_vm9 }
  0x47   :  { %6118 = vst [vmem:[#allocation22_spill] sm:$0xff] %v6117_v30  ;;  %v6122_v44 = vsel %vm4490_vm14, 4294967295, %v6121_v44  ;;  %v4494_v45 = vsub.f32 %v112_v33, %v112_v33  ;;  %v4496_v46 = vsub.f32 %v113_v34, %v113_v34  ;;  %v4498_v47 = vsub.f32 %v114_v36, %v114_v36  ;;  %vm4546_vm3 = vmpackc.low %vm99_vm12, %vm98_vm11 }
  0x48   :  { %6123 = vst [vmem:[#allocation25_spill] sm:$0xff] %v6122_v44  ;;  %v4500_v48 = vsub.f32 %v115_v37, %v115_v37  ;;  %vm101_vm15 = vcmp.eq.s32.totalorder %v4382_v19, %v4328_v5  ;;  %vm102_vm0 = vcmp.eq.s32.totalorder %v4385_v20, %v4328_v5  ;;  %3504 = vmatpush3.bf16.msk.msra.mxu1 %vm4426_vm8, %v5952_v16  ;;  %v6126_v55 = vsel %vm4546_vm3, 4294967295, %v6125_v55 }
  0x49   :  { %3600 = vmatpush3.bf16.msk.msra.mxu0 %vm4426_vm8, %v5952_v16  ;;  %v117_v49 = vsel %vm101_vm15, 1.0, %v5950_v10  ;;  %v4516_v50 = vsub.f32 %v116_v39, %v116_v39  ;;  %vm103_vm1 = vcmp.eq.s32.totalorder %v4388_v21, %v4328_v5  ;;  %v118_v51 = vsel %vm102_vm0, 1.0, %v5950_v10  ;;  %3506 = vmatprep.subr.msk.bf16.mxu1 %vm4490_vm14, %v5952_v16  ;;  %6127 = vst [vmem:[#allocation27_spill] sm:$0xff] %v6126_v55  ;;  %vm4599_vm7 = vmpackc.low %vm101_vm15, %vm100_vm13 }
  0x4a   :  { %3602 = vmatprep.subr.msk.bf16.mxu0 %vm4490_vm14, %v5952_v16  ;;  %v119_v52 = vsel %vm103_vm1, 1.0, %v5950_v10  ;;  %vm104_vm2 = vcmp.eq.s32.totalorder %v4401_v22, %v4328_v5  ;;  %v4537_v53 = vsub.f32 %v60_v31, %v4476_v40  ;;  %vm105_vm6 = vcmp.eq.s32.totalorder %v4404_v23, %v4328_v5  ;;  %vm4643_vm9 = vmpackc.low %vm103_vm1, %vm102_vm0 }
  0x4b   :  { %v120_v56 = vsel %vm104_vm2, 1.0, %v5950_v10  ;;  %v235_v57 = vand.u32 4294901760, %v4408_v25  ;;  %v4558_v58 = vsub.f32 %v61_v32, %v4478_v41  ;;  %v121_v59 = vsel %vm105_vm6, 1.0, %v5950_v10  ;;  %vm4680_vm10 = vmpackc.low %vm105_vm6, %vm104_vm2 }
  0x4c   :  { %6124 = vst [vmem:[#allocation26_spill] sm:$0xff] %v4537_v53  ;;  %v4565_v60 = vand.u32 4294901760, %v4537_v53  ;;  %v241_v61 = vand.u32 4294901760, %v4446_v35  ;;  %v247_v62 = vand.u32 4294901760, %v4464_v38  ;;  %3508 = vmatpush3.bf16.msk.msra.mxu1 %vm4490_vm14, %v5952_v16  ;;  %v4575_v63 = vsub.f32 %v117_v49, %v117_v49 }
  0x4d   :  { %6128 = vst [vmem:[#allocation28_spill] sm:$0xff] %v4558_v58  ;;  %3604 = vmatpush3.bf16.msk.msra.mxu0 %vm4490_vm14, %v5952_v16  ;;  %v230_v0 = vsub.f32 %v4406_v24, %v229_v54  ;;  %v236_v11 = vsub.f32 %v4408_v25, %v235_v57  ;;  %3510 = vmatprep.subr.msk.bf16.mxu1 %vm4546_vm3, %v5952_v16  ;;  %v4590_v27 = vand.u32 4294901760, %v4558_v58  ;;  %v253_v28 = vand.u32 4294901760, %v4480_v42 }
  0x4e   :  { %6129 = vst [vmem:[#allocation29_spill] sm:$0xff] %v4565_v60  ;;  %3606 = vmatprep.subr.msk.bf16.mxu0 %vm4546_vm3, %v5952_v16  ;;  %v4585_v12 = vsub.f32 %v118_v51, %v118_v51  ;;  %v190_v26 = vsub.f32 %v4537_v53, %v4565_v60  ;;  %v6131_v29 = vmov 0  ;;  %v4603_v31 = vsub.f32 %v119_v52, %v119_v52 }
  0x4f   :  { %6130 = vst [vmem:[#allocation30_spill] sm:$0xff] %v4590_v27  ;;  %v6132_v29 = vsel %vm4599_vm7, 4294967295, %v6131_v29  ;;  %v4605_v32 = vsub.f32 %v120_v56, %v120_v56  ;;  %v4607_v33 = vsub.f32 %v121_v59, %v121_v59  ;;  %2955 = vmatprep.mubr.f32.mxu0 %v4565_v60  ;;  %v259_v34 = vand.u32 4294901760, %v4482_v43 }
  0x50   :  { %6133 = vst [vmem:[#allocation31_spill] sm:$0xff] %v6132_v29  ;;  %v4611_v36 = vand.u32 4294901760, %v190_v26  ;;  %v4613_v37 = vpack.c.bf16 %v235_v57, %v229_v54  ;;  %v242_v39 = vsub.f32 %v4446_v35, %v241_v61  ;;  %v248_v49 = vsub.f32 %v4464_v38, %v247_v62  ;;  %3512 = vmatpush3.bf16.msk.msra.mxu1 %vm4546_vm3, %v5952_v16 }
  0x51   :  { %3608 = vmatpush3.bf16.msk.msra.mxu0 %vm4546_vm3, %v5952_v16  ;;  %v231_v51 = vand.u32 4294901760, %v230_v0  ;;  %v237_v52 = vand.u32 4294901760, %v236_v11  ;;  %v4623_v56 = vpack.c.bf16 %v247_v62, %v241_v61  ;;  %v265_v59 = vand.u32 4294901760, %v4494_v45  ;;  %3514 = vmatprep.subr.msk.bf16.mxu1 %vm4599_vm7, %v5952_v16 }
  0x52   :  { %6134 = vst [vmem:[#allocation32_spill] sm:$0xff] %v4611_v36  ;;  %3610 = vmatprep.subr.msk.bf16.mxu0 %vm4599_vm7, %v5952_v16  ;;  %v200_v54 = vsub.f32 %v4558_v58, %v4590_v27  ;;  %v254_v57 = vsub.f32 %v4480_v42, %v253_v28  ;;  %v271_v0 = vand.u32 4294901760, %v4496_v46  ;;  %v277_v61 = vand.u32 4294901760, %v4498_v47  ;;  %2841 = vmatprep.mubr.f32.mxu1 %v4611_v36 }
  0x53   :  { %v6135_v62 = vmov 0  ;;  %v260_v11 = vsub.f32 %v4482_v43, %v259_v34  ;;  %v283_v26 = vand.u32 4294901760, %v4500_v48  ;;  %v289_v10 = vand.u32 4294901760, %v4516_v50 }
  0x54   :  { %v6136_v62 = vsel %vm4643_vm9, 4294967295, %v6135_v62  ;;  %v295_v16 = vand.u32 4294901760, %v4575_v63  ;;  %v243_v60 = vand.u32 4294901760, %v242_v39  ;;  %v249_v58 = vand.u32 4294901760, %v248_v49  ;;  %v62_v39 = vld [vmem:[#allocation5 + $0x10] sm:$0xff] }
  0x55   :  { %6137 = vst [vmem:[#allocation33_spill] sm:$0xff] %v6136_v62  ;;  %v266_v55 = vsub.f32 %v4494_v45, %v265_v59  ;;  %v272_v44 = vsub.f32 %v4496_v46, %v271_v0  ;;  %v6138_v53 = vmov 1.0|1.0   ;;  %v278_v36 = vsub.f32 %v4498_v47, %v277_v61 }
  0x56   :  { %3516 = vmatpush3.bf16.msk.msra.mxu1 %vm4599_vm7, %v6138_v53  ;;  %3612 = vmatpush3.bf16.msk.msra.mxu0 %vm4599_vm7, %v6138_v53  ;;  %v284_v30 = vsub.f32 %v4500_v48, %v283_v26  ;;  %v290_v17 = vsub.f32 %v4516_v50, %v289_v10  ;;  %v3525_v49 = vpack.c.bf16 %v237_v52, %v231_v51  ;;  %v4669_v41 = vand.u32 4294901760, %v200_v54 }
  0x57   :  { %3518 = vmatprep.subr.msk.bf16.mxu1 %vm4643_vm9, %v6138_v53  ;;  %3614 = vmatprep.subr.msk.bf16.mxu0 %vm4643_vm9, %v6138_v53  ;;  %v4671_v29 = vpack.c.bf16 %v259_v34, %v253_v28  ;;  %v296_v13 = vsub.f32 %v4575_v63, %v295_v16  ;;  %v255_v20 = vand.u32 4294901760, %v254_v57  ;;  %v261_v19 = vand.u32 4294901760, %v260_v11  ;;  %v63_v28 = vld [vmem:[#allocation5 + $0x18] sm:$0xff] }
  0x58   :  { %6139 = vst [vmem:[#allocation34_spill] sm:$0xff] %v4669_v41  ;;  %v301_v51 = vand.u32 4294901760, %v4585_v12  ;;  %v307_v52 = vand.u32 4294901760, %v4603_v31  ;;  %v4686_v34 = vpack.c.bf16 %v249_v58, %v243_v60  ;;  %v267_v54 = vand.u32 4294901760, %v266_v55 }
  0x59   :  { %v4688_v18 = vand.u32 4294901760, %v62_v39  ;;  %v313_v22 = vand.u32 4294901760, %v4605_v32  ;;  %v273_v5 = vand.u32 4294901760, %v272_v44  ;;  %v279_v57 = vand.u32 4294901760, %v278_v36 }
  0x5a   :  { %3520 = vmatpush3.bf16.msk.msra.mxu1 %vm4643_vm9, %v6138_v53  ;;  %3616 = vmatpush3.bf16.msk.msra.mxu0 %vm4643_vm9, %v6138_v53  ;;  %v285_v11 = vand.u32 4294901760, %v284_v30  ;;  %v291_v23 = vand.u32 4294901760, %v290_v17  ;;  %v297_v55 = vand.u32 4294901760, %v296_v13  ;;  %v319_v60 = vand.u32 4294901760, %v4607_v33 }
  0x5b   :  { %3522 = vmatprep.subr.msk.bf16.mxu1 %vm4680_vm10, %v6138_v53  ;;  %3618 = vmatprep.subr.msk.bf16.mxu0 %vm4680_vm10, %v6138_v53  ;;  %v4704_v58 = vsub.f32 %v62_v39, %v4688_v18  ;;  %v4707_v62 = vand.u32 4294901760, %v63_v28  ;;  %v4709_v44 = vpack.c.bf16 %v261_v19, %v255_v20  ;;  %v4711_v30 = vpack.c.bf16 %v271_v0, %v265_v59  ;;  %v4739_v0 = vld [vmem:[%s5945_s1] ss:$0 sm:$0xff]  ;;  %s4244_s1 = smov [#allocation8]  }
  0x5c   :  { %v302_v17 = vsub.f32 %v4585_v12, %v301_v51  ;;  %v308_v36 = vsub.f32 %v4603_v31, %v307_v52  ;;  %v4715_v15 = vpack.c.bf16 %v283_v26, %v277_v61  ;;  %v314_v13 = vsub.f32 %v4605_v32, %v313_v22 }
  0x5d   :  { %6142 = vst [vmem:[#allocation35_spill] sm:$0xff] %v4704_v58  ;;  %v4718_v14 = vand.u32 4294901760, %v4704_v58  ;;  %v4722_v39 = vsub.f32 %v63_v28, %v4707_v62  ;;  %v4730_v19 = vpack.c.bf16 %v273_v5, %v267_v54  ;;  %v4732_v20 = vpack.c.bf16 %v285_v11, %v279_v57 }
  0x5e   :  { %3524 = vmatpush3.bf16.msk.msra.mxu1 %vm4680_vm10, %v6138_v53  ;;  %3620 = vmatpush3.bf16.msk.msra.mxu0 %vm4680_vm10, %v6138_v53  ;;  %v4734_v59 = vpack.c.bf16 %v295_v16, %v289_v10  ;;  %v4742_v61 = vpack.c.bf16 %v297_v55, %v291_v23  ;;  %v320_v28 = vsub.f32 %v4607_v33, %v319_v60  ;;  %v4753_v10 = vld [vmem:[%s5946_s2] ss:$0 sm:$0xff]  ;;  %v303_v16 = vand.u32 4294901760, %v302_v17  ;;  %s2292_s2 = sshll.u32 %s4244_s1, 4  ;;  %s2293_s2 = int_to_ptr.vmem [resolvable:$true] %s2292_s2 }
  0x5f   :  { %6143 = vst [vmem:[#allocation36_spill] sm:$0xff] %v4718_v14  ;;  %6144 = vst [vmem:[#allocation37_spill] sm:$0xff] %v4722_v39  ;;  %3526 = vmatprep.subr.bf16.mxu1 %v3525_v49  ;;  %3622 = vmatprep.subr.bf16.mxu0 %v4613_v37  ;;  %v210_v26 = vsub.f32 %v4704_v58, %v4718_v14  ;;  %v4748_v54 = vand.u32 4294901760, %v4722_v39  ;;  %v309_v5 = vand.u32 4294901760, %v308_v36  ;;  %v315_v55 = vand.u32 4294901760, %v314_v13  ;;  %s4209_s8 = scalar_lea.vmem %s2293_s2, 16  ;;  %p4214_p11 = scmp.lt.s32.totalorder %s2293_s2, %s2293_s2 }
  0x60   :  { %v4755_v57 = vpack.c.bf16 %v307_v52, %v301_v51  ;;  %v4757_v11 = vpack.c.bf16 %v319_v60, %v313_v22  ;;  %vm801_vm11 = vcmp.eq.s32.totalorder %v4317_v1, %v4739_v0  ;;  %vm802_vm12 = vcmp.eq.s32.totalorder %v4320_v2, %v4739_v0  ;;  %p4210_p10 = scmp.ne.s32.totalorder %s2293_s2, %s4209_s8  ;;  %s4213_s9 = scalar_lea.vmem %s2293_s2, 32 }
  0x61   :  { %6145 = vst [vmem:[#allocation38_spill] sm:$0xff] %v4748_v54  ;;  %2842 = vmatmul.mubr.f32.vlgmr.msra.gmra.mrb[0].mxu1 %v4669_v41  ;;  %2956 = vmatmul.mubr.f32.vlgmr.msra.gmra.mrb[0].mxu0 %v4590_v27  ;;  %v4761_v23 = vand.u32 4294901760, %v210_v26  ;;  %v220_v58 = vsub.f32 %v4722_v39, %v4748_v54  ;;  %v6147_v22 = vmov 0.0   ;;  %vm1512_vm13 = vcmp.eq.s32.totalorder %v4317_v1, %v4753_v10  ;;  %vm4780_vm0 = vmpackc.low %vm802_vm12, %vm801_vm11  ;;  %v6189_v41 = vld [vmem:[#allocation18_spill] sm:$0xff]  ;;  %p4215_p12 = scmp.lt.s32.totalorder %s4213_s9, %s4209_s8 }
  0x62   :  { %3528 = vmatpush3.bf16.msra.mxu1 %v3525_v49  ;;  %3624 = vmatpush3.bf16.msra.mxu0 %v4613_v37  ;;  %v817_v51 = vsel %vm801_vm11, 1.0, %v6147_v22  ;;  %vm1513_vm15 = vcmp.eq.s32.totalorder %v4320_v2, %v4753_v10  ;;  %v321_v52 = vand.u32 4294901760, %v320_v28  ;;  %v818_v37 = vsel %vm802_vm12, 1.0, %v6147_v22 }
  0x63   :  { %6146 = vst [vmem:[#allocation39_spill] sm:$0xff] %v4761_v23  ;;  %3530 = vmatprep.subr.bf16.mxu1 %v4686_v34  ;;  %3626 = vmatprep.subr.bf16.mxu0 %v4623_v56  ;;  %v4777_v60 = vand.u32 4294901760, %v220_v58  ;;  %v6149_v49 = vmov 0  ;;  %v1528_v17 = vsel %vm1512_vm13, 1.0, %v6147_v22  ;;  %v4785_v36 = vpack.c.bf16 %v309_v5, %v303_v16  ;;  %vm4794_vm1 = vmpackc.low %vm1513_vm15, %vm1512_vm13  ;;  %p4216_p13 = por %p4215_p12, %p4214_p11 }
  0x64   :  { %v6150_v49 = vsel %vm4780_vm0, 4294967295, %v6149_v49  ;;  %2844 = vmatprep.mubr.f32.mxu1 %v4761_v23  ;;  %2958 = vmatprep.mubr.f32.mxu0 %v4718_v14  ;;  %v4791_v1 = vpack.c.bf16 %v4408_v25, %v4406_v24  ;;  %v1529_v2 = vsel %vm1513_vm15, 1.0, %v6147_v22  ;;  %v6152_v58 = vmov 0  ;;  %v6181_v14 = vld [vmem:[#allocation16_spill] sm:$0xff] }
  0x65   :  { %6148 = vst [vmem:[#allocation40_spill] sm:$0xff] %v4777_v60  ;;  %6151 = vst [vmem:[#allocation41_spill] sm:$0xff] %v6150_v49  ;;  %v6153_v58 = vsel %vm4794_vm1, 4294967295, %v6152_v58  ;;  %vm803_vm2 = vcmp.eq.s32.totalorder %v4323_v3, %v4739_v0  ;;  %2845 = vmatmul.mubr.f32.gmra.mrb[2].mxu1 %v4777_v60  ;;  %2959 = vmatmul.mubr.f32.gmra.mrb[2].mxu0 %v4748_v54  ;;  %v4804_v13 = vpack.c.bf16 %v4464_v38, %v4446_v35  ;;  %v6155_v35 = vmov 0  ;;  %v6182_v60 = vld [vmem:[#allocation17_spill] sm:$0xff]  ;;  %p4217_p0 = pnand %p4216_p13, %p4210_p10 }
  0x66   :  { %6154 = vst [vmem:[#allocation42_spill] sm:$0xff] %v6153_v58  ;;  %vm804_vm6 = vcmp.eq.s32.totalorder %v4326_v4, %v4739_v0  ;;  %v819_v24 = vsel %vm803_vm2, 1.0, %v6147_v22  ;;  %vm1514_vm11 = vcmp.eq.s32.totalorder %v4323_v3, %v4753_v10  ;;  %3532 = vmatpush3.bf16.msra.mxu1 %v4686_v34  ;;  %3628 = vmatpush3.bf16.msra.mxu0 %v4623_v56  ;;  %v6158_v56 = vmov 0  ;;  %v6209_v58 = vld [vmem:[#allocation24_spill] sm:$0xff] }
  0x67   :  { %v4815_v25 = vpack.c.bf16 %v4482_v43, %v4480_v42  ;;  %v820_v26 = vsel %vm804_vm6, 1.0, %v6147_v22  ;;  %vm4818_vm12 = vmpackc.low %vm804_vm6, %vm803_vm2  ;;  %vm1515_vm13 = vcmp.eq.s32.totalorder %v4326_v4, %v4753_v10  ;;  %v1530_v38 = vsel %vm1514_vm11, 1.0, %v6147_v22  ;;  %3534 = vmatprep.subr.bf16.mxu1 %v4709_v44  ;;  %3630 = vmatprep.subr.bf16.mxu0 %v4671_v29 }
  0x68   :  { %v6156_v35 = vsel %vm4818_vm12, 4294967295, %v6155_v35  ;;  %v4827_v3 = vpack.c.bf16 %v321_v52, %v315_v55  ;;  %v4831_v42 = vpack.c.bf16 %v4496_v46, %v4494_v45  ;;  %v1531_v43 = vsel %vm1515_vm13, 1.0, %v6147_v22  ;;  %vm4834_vm15 = vmpackc.low %vm1515_vm13, %vm1514_vm11  ;;  %2879 = vmatprep.mubr.f32.mxu1 %v4476_v40  ;;  %2993 = vmatprep.mubr.f32.mxu0 %v4476_v40  ;;  %v6173_v52 = vld [vmem:[#allocation13_spill] sm:$0xff] }
  0x69   :  { %6157 = vst [vmem:[#allocation43_spill] sm:$0xff] %v6156_v35  ;;  %v6159_v56 = vsel %vm4834_vm15, 4294967295, %v6158_v56  ;;  %vm805_vm2 = vcmp.eq.s32.totalorder %v4331_v6, %v4739_v0  ;;  %v4844_v4 = vpack.c.bf16 %v4500_v48, %v4498_v47  ;;  %vm806_vm6 = vcmp.eq.s32.totalorder %v4334_v7, %v4739_v0 }
  0x6a   :  { %6160 = vst [vmem:[#allocation44_spill] sm:$0xff] %v6159_v56  ;;  %v821_v45 = vsel %vm805_vm2, 1.0, %v6147_v22  ;;  %vm1516_vm11 = vcmp.eq.s32.totalorder %v4331_v6, %v4753_v10  ;;  %v4853_v46 = vpack.c.bf16 %v4575_v63, %v4516_v50  ;;  %v822_v34 = vsel %vm806_vm6, 1.0, %v6147_v22  ;;  %vm4856_vm13 = vmpackc.low %vm806_vm6, %vm805_vm2  ;;  %3536 = vmatpush3.bf16.msra.mxu1 %v4709_v44  ;;  %3632 = vmatpush3.bf16.msra.mxu0 %v4671_v29 }
  0x6b   :  { %v6161_v28 = vmov 0  ;;  %vm1517_vm15 = vcmp.eq.s32.totalorder %v4334_v7, %v4753_v10  ;;  %v1532_v47 = vsel %vm1516_vm11, 1.0, %v6147_v22  ;;  %v4867_v6 = vpack.c.bf16 %v4603_v31, %v4585_v12  ;;  %3538 = vmatprep.subr.bf16.mxu1 %v4730_v19  ;;  %3634 = vmatprep.subr.bf16.mxu0 %v4711_v30 }
  0x6c   :  { %v6162_v28 = vsel %vm4856_vm13, 4294967295, %v6161_v28  ;;  %v4869_v48 = vsub.f32 %v817_v51, %v817_v51  ;;  %v1533_v50 = vsel %vm1517_vm15, 1.0, %v6147_v22  ;;  %vm4872_vm2 = vmpackc.low %vm1517_vm15, %vm1516_vm11  ;;  %v6164_v63 = vmov 0 }
  0x6d   :  { %6163 = vst [vmem:[#allocation45_spill] sm:$0xff] %v6162_v28  ;;  %v6165_v63 = vsel %vm4872_vm2, 4294967295, %v6164_v63  ;;  %vm807_vm6 = vcmp.eq.s32.totalorder %v4337_v8, %v4739_v0  ;;  %v4880_v7 = vsub.f32 %v818_v37, %v818_v37  ;;  %vm808_vm13 = vcmp.eq.s32.totalorder %v4340_v9, %v4739_v0  ;;  %v6174_v37 = vld [vmem:[#allocation14_spill] sm:$0xff] }
  0x6e   :  { %6166 = vst [vmem:[#allocation46_spill] sm:$0xff] %v6165_v63  ;;  %v823_v12 = vsel %vm807_vm6, 1.0, %v6147_v22  ;;  %vm1518_vm15 = vcmp.eq.s32.totalorder %v4337_v8, %v4753_v10  ;;  %v4887_v29 = vsub.f32 %v1528_v17, %v1528_v17  ;;  %v824_v31 = vsel %vm808_vm13, 1.0, %v6147_v22  ;;  %vm4890_vm11 = vmpackc.low %vm808_vm13, %vm807_vm6  ;;  %3540 = vmatpush3.bf16.msra.mxu1 %v4730_v19  ;;  %3636 = vmatpush3.bf16.msra.mxu0 %v4711_v30 }
  0x6f   :  { %v6167_v44 = vmov 0  ;;  %vm1519_vm2 = vcmp.eq.s32.totalorder %v4340_v9, %v4753_v10  ;;  %v1534_v16 = vsel %vm1518_vm15, 1.0, %v6147_v22  ;;  %v4897_v5 = vsub.f32 %v1529_v2, %v1529_v2  ;;  %3542 = vmatprep.subr.bf16.mxu1 %v4732_v20  ;;  %3638 = vmatprep.subr.bf16.mxu0 %v4715_v15 }
  0x70   :  { %v6168_v44 = vsel %vm4890_vm11, 4294967295, %v6167_v44  ;;  %v4899_v55 = vsub.f32 %v819_v24, %v819_v24  ;;  %v1535_v51 = vsel %vm1519_vm2, 1.0, %v6147_v22  ;;  %vm4902_vm12 = vmpackc.low %vm1519_vm2, %vm1518_vm15  ;;  %v6170_v8 = vmov 0 }
  0x71   :  { %6169 = vst [vmem:[#allocation47_spill] sm:$0xff] %v6168_v44  ;;  %v6171_v8 = vsel %vm4902_vm12, 4294967295, %v6170_v8  ;;  %vm809_vm13 = vcmp.eq.s32.totalorder %v6173_v52, %v4739_v0  ;;  %v4910_v9 = vsub.f32 %v820_v26, %v820_v26  ;;  %vm810_vm6 = vcmp.eq.s32.totalorder %v6174_v37, %v4739_v0 }
  0x72   :  { %6172 = vst [vmem:[#allocation48_spill] sm:$0xff] %v6171_v8  ;;  %v825_v17 = vsel %vm809_vm13, 1.0, %v6147_v22  ;;  %vm1520_vm2 = vcmp.eq.s32.totalorder %v6173_v52, %v4753_v10  ;;  %v4919_v2 = vsub.f32 %v1530_v38, %v1530_v38  ;;  %v826_v19 = vsel %vm810_vm6, 1.0, %v6147_v22  ;;  %vm4922_vm15 = vmpackc.low %vm810_vm6, %vm809_vm13  ;;  %3544 = vmatpush3.bf16.msra.mxu1 %v4732_v20  ;;  %3640 = vmatpush3.bf16.msra.mxu0 %v4715_v15 }
  0x73   :  { %v6175_v30 = vmov 0  ;;  %vm1521_vm12 = vcmp.eq.s32.totalorder %v6174_v37, %v4753_v10  ;;  %v1536_v24 = vsel %vm1520_vm2, 1.0, %v6147_v22  ;;  %v4929_v26 = vsub.f32 %v1531_v43, %v1531_v43  ;;  %3546 = vmatprep.subr.bf16.mxu1 %v4742_v61  ;;  %3642 = vmatprep.subr.bf16.mxu0 %v4734_v59 }
  0x74   :  { %v6176_v30 = vsel %vm4922_vm15, 4294967295, %v6175_v30  ;;  %v4931_v52 = vsub.f32 %v821_v45, %v821_v45  ;;  %v1537_v54 = vsel %vm1521_vm12, 1.0, %v6147_v22  ;;  %vm4934_vm11 = vmpackc.low %vm1521_vm12, %vm1520_vm2  ;;  %v6178_v38 = vmov 0 }
  0x75   :  { %6177 = vst [vmem:[#allocation13_spill] sm:$0xff] %v6176_v30  ;;  %v6179_v38 = vsel %vm4934_vm11, 4294967295, %v6178_v38  ;;  %vm811_vm13 = vcmp.eq.s32.totalorder %v6181_v14, %v4739_v0  ;;  %v4940_v27 = vsub.f32 %v822_v34, %v822_v34  ;;  %vm812_vm6 = vcmp.eq.s32.totalorder %v6182_v60, %v4739_v0 }
  0x76   :  { %6180 = vst [vmem:[#allocation14_spill] sm:$0xff] %v6179_v38  ;;  %v827_v37 = vsel %vm811_vm13, 1.0, %v6147_v22  ;;  %vm1522_vm15 = vcmp.eq.s32.totalorder %v6181_v14, %v4753_v10  ;;  %v4949_v43 = vsub.f32 %v1532_v47, %v1532_v47  ;;  %v828_v45 = vsel %vm812_vm6, 1.0, %v6147_v22  ;;  %vm4952_vm12 = vmpackc.low %vm812_vm6, %vm811_vm13  ;;  %3548 = vmatpush3.bf16.msra.mxu1 %v4742_v61  ;;  %3644 = vmatpush3.bf16.msra.mxu0 %v4734_v59  ;;  %v6198_v59 = vld [vmem:[#allocation21_spill] sm:$0xff] }
  0x77   :  { %v6183_v23 = vmov 0  ;;  %vm1523_vm2 = vcmp.eq.s32.totalorder %v6182_v60, %v4753_v10  ;;  %v1538_v34 = vsel %vm1522_vm15, 1.0, %v6147_v22  ;;  %v4961_v14 = vsub.f32 %v1533_v50, %v1533_v50  ;;  %3550 = vmatprep.subr.bf16.mxu1 %v4785_v36  ;;  %3646 = vmatprep.subr.bf16.mxu0 %v4755_v57 }
  0x78   :  { %v6184_v23 = vsel %vm4952_vm12, 4294967295, %v6183_v23  ;;  %v4963_v15 = vsub.f32 %v823_v12, %v823_v12  ;;  %v1539_v20 = vsel %vm1523_vm2, 1.0, %v6147_v22  ;;  %vm4966_vm11 = vmpackc.low %vm1523_vm2, %vm1522_vm15  ;;  %v6186_v47 = vmov 0 }
  0x79   :  { %6185 = vst [vmem:[#allocation16_spill] sm:$0xff] %v6184_v23  ;;  %v6187_v47 = vsel %vm4966_vm11, 4294967295, %v6186_v47  ;;  %vm813_vm13 = vcmp.eq.s32.totalorder %v6189_v41, %v4739_v0  ;;  %v4972_v60 = vsub.f32 %v824_v31, %v824_v31  ;;  %v6190_v23 = vld [vmem:[#allocation19_spill] sm:$0xff]  ;;  %vm1524_vm12 = vcmp.eq.s32.totalorder %v6189_v41, %v4753_v10 }
  0x7a   :  { %6188 = vst [vmem:[#allocation17_spill] sm:$0xff] %v6187_v47  ;;  %vm814_vm6 = vcmp.eq.s32.totalorder %v6190_v23, %v4739_v0  ;;  %v829_v38 = vsel %vm813_vm13, 1.0, %v6147_v22  ;;  %v4979_v50 = vsub.f32 %v1534_v16, %v1534_v16  ;;  %v6191_v30 = vmov 0  ;;  %3552 = vmatpush3.bf16.msra.mxu1 %v4785_v36  ;;  %3648 = vmatpush3.bf16.msra.mxu0 %v4755_v57 }
  0x7b   :  { %v830_v12 = vsel %vm814_vm6, 1.0, %v6147_v22  ;;  %vm4982_vm15 = vmpackc.low %vm814_vm6, %vm813_vm13  ;;  %vm1525_vm2 = vcmp.eq.s32.totalorder %v6190_v23, %v4753_v10  ;;  %v1540_v31 = vsel %vm1524_vm12, 1.0, %v6147_v22  ;;  %v4991_v47 = vsub.f32 %v1535_v51, %v1535_v51  ;;  %3554 = vmatprep.subr.bf16.mxu1 %v4827_v3  ;;  %3650 = vmatprep.subr.bf16.mxu0 %v4757_v11 }
  0x7c   :  { %v6192_v30 = vsel %vm4982_vm15, 4294967295, %v6191_v30  ;;  %v4993_v41 = vsub.f32 %v825_v17, %v825_v17  ;;  %v1541_v16 = vsel %vm1525_vm2, 1.0, %v6147_v22  ;;  %vm4996_vm11 = vmpackc.low %vm1525_vm2, %vm1524_vm12  ;;  %v6194_v8 = vmov 0 }
  0x7d   :  { %6193 = vst [vmem:[#allocation18_spill] sm:$0xff] %v6192_v30  ;;  %v6195_v8 = vsel %vm4996_vm11, 4294967295, %v6194_v8  ;;  %v6197_v30 = vld [vmem:[#allocation20_spill] sm:$0xff]  ;;  %v5004_v61 = vsub.f32 %v826_v19, %v826_v19  ;;  %vm816_vm6 = vcmp.eq.s32.totalorder %v6198_v59, %v4739_v0  ;;  %v5011_v51 = vsub.f32 %v1536_v24, %v1536_v24 }
  0x7e   :  { %6196 = vst [vmem:[#allocation19_spill] sm:$0xff] %v6195_v8  ;;  %vm815_vm13 = vcmp.eq.s32.totalorder %v6197_v30, %v4739_v0  ;;  %vm1526_vm12 = vcmp.eq.s32.totalorder %v6197_v30, %v4753_v10  ;;  %v832_v17 = vsel %vm816_vm6, 1.0, %v6147_v22  ;;  %v6199_v8 = vmov 0  ;;  %3556 = vmatpush3.bf16.msra.mxu1 %v4827_v3  ;;  %3652 = vmatpush3.bf16.msra.mxu0 %v4757_v11  ;;  %v5082_v11 = vld [vmem:[#allocation7] sm:$0xff] }
  0x7f   :  { %v831_v23 = vsel %vm815_vm13, 1.0, %v6147_v22  ;;  %vm5014_vm2 = vmpackc.low %vm816_vm6, %vm815_vm13  ;;  %vm1527_vm11 = vcmp.eq.s32.totalorder %v6198_v59, %v4753_v10  ;;  %v1542_v19 = vsel %vm1526_vm12, 1.0, %v6147_v22  ;;  %v5021_v44 = vsub.f32 %v1537_v54, %v1537_v54  ;;  %3558 = vmatprep.subr.bf16.mxu1 %v4791_v1  ;;  %3654 = vmatprep.subr.msk.bf16.mxu0 %vm4352_vm4, %v6138_v53 }
  0x80   :  { %v6200_v8 = vsel %vm5014_vm2, 4294967295, %v6199_v8  ;;  %v5023_v0 = vsub.f32 %v827_v37, %v827_v37  ;;  %v5025_v63 = vsub.f32 %v828_v45, %v828_v45  ;;  %v5028_v30 = vsel %vm1527_vm11, 1.0, %v6147_v22  ;;  %vm5030_vm15 = vmpackc.low %vm1527_vm11, %vm1526_vm12 }
  0x81   :  { %6201 = vst [vmem:[#allocation20_spill] sm:$0xff] %v6200_v8  ;;  %v6202_v24 = vmov 0  ;;  %v5036_v10 = vsub.f32 %v1538_v34, %v1538_v34  ;;  %v6036_v54 = vand.u32 4294901760, %v4869_v48  ;;  %v6039_v37 = vand.u32 4294901760, %v4880_v7  ;;  %2880 = vmatmul.mubr.f32.vlgmr.msra.gmra.mrb[0].mxu1 %v6209_v58  ;;  %2994 = vmatmul.mubr.f32.vlgmr.msra.gmra.mrb[0].mxu0 %v6209_v58 }
  0x82   :  { %v6203_v24 = vsel %vm5030_vm15, 4294967295, %v6202_v24  ;;  %v5043_v22 = vsub.f32 %v1539_v20, %v1539_v20  ;;  %v5045_v59 = vsub.f32 %v829_v38, %v829_v38  ;;  %v6042_v36 = vand.u32 4294901760, %v4897_v5  ;;  %3560 = vmatpush3.bf16.msra.mxu1 %v4791_v1  ;;  %3656 = vmatpush3.bf16.msk.msra.mxu0 %vm4352_vm4, %v6138_v53 }
  0x83   :  { %6204 = vst [vmem:[#allocation21_spill] sm:$0xff] %v6203_v24  ;;  %v941_v34 = vsub.f32 %v4869_v48, %v6036_v54  ;;  %v947_v45 = vsub.f32 %v4880_v7, %v6039_v37  ;;  %v6205_v24 = vand.u32 4294901760, %v4887_v29  ;;  %v6045_v20 = vand.u32 4294901760, %v4910_v9  ;;  %3562 = vmatprep.subr.bf16.mxu1 %v4804_v13  ;;  %3658 = vmatprep.subr.msk.bf16.mxu0 %vm4374_vm5, %v6138_v53 }
  0x84   :  { %v5059_v38 = vsub.f32 %v830_v12, %v830_v12  ;;  %v5061_v28 = vsub.f32 %v1540_v31, %v1540_v31  ;;  %v1658_v57 = vsub.f32 %v4897_v5, %v6042_v36  ;;  %v6206_v54 = vand.u32 4294901760, %v4899_v55  ;;  %2882 = vmatprep.mubr.f32.mxu1 %v4688_v18  ;;  %2996 = vmatprep.mubr.f32.mxu0 %v4688_v18 }
  0x85   :  { %v1652_v8 = vsub.f32 %v4887_v29, %v6205_v24  ;;  %v942_v37 = vand.u32 4294901760, %v941_v34  ;;  %v948_v24 = vand.u32 4294901760, %v947_v45  ;;  %v959_v12 = vsub.f32 %v4910_v9, %v6045_v20  ;;  %2883 = vmatmul.mubr.f32.gmra.mrb[2].mxu1 %v4707_v62  ;;  %2997 = vmatmul.mubr.f32.gmra.mrb[2].mxu0 %v4707_v62 }
  0x86   :  { %v953_v39 = vsub.f32 %v4899_v55, %v6206_v54  ;;  %v5078_v36 = vsub.f32 %v1541_v16, %v1541_v16  ;;  %v5080_v54 = vsub.f32 %v831_v23, %v831_v23  ;;  %v1659_v3 = vand.u32 4294901760, %v1658_v57  ;;  %3564 = vmatpush3.bf16.msra.mxu1 %v4804_v13  ;;  %3660 = vmatpush3.bf16.msk.msra.mxu0 %vm4374_vm5, %v6138_v53 }
  0x87   :  { %v1653_v56 = vand.u32 4294901760, %v1652_v8  ;;  %v5084_v45 = vpack.c.bf16 %v948_v24, %v942_v37  ;;  %v960_v8 = vand.u32 4294901760, %v959_v12  ;;  %v6052_v34 = vand.u32 4294901760, %v4919_v2  ;;  %3566 = vmatprep.subr.bf16.mxu1 %v4815_v25  ;;  %3662 = vmatprep.subr.msk.bf16.mxu0 %vm4426_vm8, %v6138_v53 }
  0x88   :  { %v954_v35 = vand.u32 4294901760, %v953_v39  ;;  %v6050_v20 = vand.u32 4294901760, %v4929_v26  ;;  %v5090_v49 = vsub.f32 %v832_v17, %v832_v17  ;;  %v5092_v16 = vsub.f32 %v1542_v19, %v1542_v19  ;;  %3031 = vmatprep.mubr.f32.mxu0 %v4476_v40 }
  0x89   :  { %6208 = vst [vmem:[#allocation12_spill] sm:$0xff] %v5084_v45  ;;  %v5094_v23 = vpack.c.bf16 %v1659_v3, %v1653_v56  ;;  %v6051_v39 = vand.u32 4294901760, %v4931_v52  ;;  %v1664_v57 = vsub.f32 %v4919_v2, %v6052_v34  ;;  %v6053_v56 = vand.u32 4294901760, %v4940_v27 }
  0x8a   :  { %v5101_v37 = vpack.c.bf16 %v960_v8, %v954_v35  ;;  %v1670_v17 = vsub.f32 %v4929_v26, %v6050_v20  ;;  %v5115_v19 = vand.u32 4294901760, %v5082_v11  ;;  %v6055_v24 = vand.u32 4294901760, %v4949_v43  ;;  %3568 = vmatpush3.bf16.msra.mxu1 %v4815_v25  ;;  %3664 = vmatpush3.bf16.msk.msra.mxu0 %vm4426_vm8, %v6138_v53 }
  0x8b   :  { %6210 = vst [vmem:[#allocation24_spill] sm:$0xff] %v5094_v23  ;;  %v965_v35 = vsub.f32 %v4931_v52, %v6051_v39  ;;  %v6056_v12 = vand.u32 4294901760, %v4961_v14  ;;  %v1665_v31 = vand.u32 4294901760, %v1664_v57  ;;  %v971_v8 = vsub.f32 %v4940_v27, %v6053_v56  ;;  %3570 = vmatprep.subr.bf16.mxu1 %v4831_v42  ;;  %3666 = vmatprep.subr.msk.bf16.mxu0 %vm4490_vm14, %v6138_v53 }
  0x8c   :  { %6211 = vst [vmem:[#allocation49_spill] sm:$0xff] %v5101_v37  ;;  %v1671_v3 = vand.u32 4294901760, %v1670_v17  ;;  %v1676_v34 = vsub.f32 %v4949_v43, %v6055_v24  ;;  %v6216_v1 = vand.u32 4294901760, %v4972_v60  ;;  %v6067_v40 = vand.u32 4294901760, %v5025_v63 }
  0x8d   :  { %v966_v39 = vand.u32 4294901760, %v965_v35  ;;  %v1682_v57 = vsub.f32 %v4961_v14, %v6056_v12  ;;  %v972_v20 = vand.u32 4294901760, %v971_v8  ;;  %v6214_v35 = vand.u32 4294901760, %v4963_v15  ;;  %v6217_v8 = vld [vmem:[#allocation26_spill] sm:$0xff] }
  0x8e   :  { %v5141_v56 = vpack.c.bf16 %v1671_v3, %v1665_v31  ;;  %v1677_v13 = vand.u32 4294901760, %v1676_v34  ;;  %v983_v31 = vsub.f32 %v4972_v60, %v6216_v1  ;;  %v6061_v3 = vand.u32 4294901760, %v4991_v47  ;;  %2917 = vmatprep.mubr.f32.mxu1 %v6217_v8  ;;  %3572 = vmatpush3.bf16.msra.mxu1 %v4831_v42 }
  0x8f   :  { %v977_v37 = vsub.f32 %v4963_v15, %v6214_v35  ;;  %v1683_v17 = vand.u32 4294901760, %v1682_v57  ;;  %v5157_v35 = vpack.c.bf16 %v972_v20, %v966_v39  ;;  %v6060_v34 = vand.u32 4294901760, %v4993_v41  ;;  %3668 = vmatpush3.bf16.msk.msra.mxu0 %vm4490_vm14, %v6138_v53  ;;  %3574 = vmatprep.subr.bf16.mxu1 %v4844_v4 }
  0x90   :  { %6213 = vst [vmem:[#allocation15_spill] sm:$0xff] %v5141_v56  ;;  %v6218_v56 = vand.u32 4294901760, %v4979_v50  ;;  %v984_v45 = vand.u32 4294901760, %v983_v31  ;;  %v1694_v1 = vsub.f32 %v4991_v47, %v6061_v3  ;;  %v6064_v8 = vand.u32 4294901760, %v5004_v61  ;;  %3670 = vmatprep.subr.msk.bf16.mxu0 %vm4546_vm3, %v6138_v53 }
  0x91   :  { %v978_v24 = vand.u32 4294901760, %v977_v37  ;;  %v5163_v57 = vpack.c.bf16 %v1683_v17, %v1677_v13  ;;  %v989_v39 = vsub.f32 %v4993_v41, %v6060_v34  ;;  %v6065_v37 = vand.u32 4294901760, %v5011_v51 }
  0x92   :  { %v1688_v23 = vsub.f32 %v4979_v50, %v6218_v56  ;;  %v6068_v56 = vand.u32 4294901760, %v5021_v44  ;;  %v1695_v13 = vand.u32 4294901760, %v1694_v1  ;;  %v6066_v12 = vand.u32 4294901760, %v5023_v0  ;;  %3576 = vmatpush3.bf16.msra.mxu1 %v4844_v4 }
  0x93   :  { %v5182_v25 = vpack.c.bf16 %v984_v45, %v978_v24  ;;  %v990_v31 = vand.u32 4294901760, %v989_v39  ;;  %v1700_v34 = vsub.f32 %v5011_v51, %v6065_v37  ;;  %3672 = vmatpush3.bf16.msk.msra.mxu0 %vm4546_vm3, %v6138_v53  ;;  %3578 = vmatprep.subr.bf16.mxu1 %v4853_v46  ;;  %v6238_v21 = vand.u32 4294901760, %v4869_v48 }
  0x94   :  { %v1689_v20 = vand.u32 4294901760, %v1688_v23  ;;  %v995_v23 = vsub.f32 %v5004_v61, %v6064_v8  ;;  %v1706_v3 = vsub.f32 %v5021_v44, %v6068_v56  ;;  %v1001_v1 = vsub.f32 %v5023_v0, %v6066_v12  ;;  %3674 = vmatprep.subr.msk.bf16.mxu0 %vm4599_vm7, %v6138_v53 }
  0x95   :  { %6220 = vst [vmem:[#allocation22_spill] sm:$0xff] %v5182_v25  ;;  %v6074_v8 = vand.u32 4294901760, %v5036_v10  ;;  %v1701_v39 = vand.u32 4294901760, %v1700_v34 }
  0x96   :  { %v5195_v45 = vpack.c.bf16 %v1695_v13, %v1689_v20  ;;  %v996_v24 = vand.u32 4294901760, %v995_v23  ;;  %v1707_v37 = vand.u32 4294901760, %v1706_v3  ;;  %v1007_v20 = vsub.f32 %v5025_v63, %v6067_v40  ;;  %3580 = vmatpush3.bf16.msra.mxu1 %v4853_v46 }
  0x97   :  { %v6073_v13 = vand.u32 4294901760, %v5043_v22  ;;  %v1002_v42 = vand.u32 4294901760, %v1001_v1  ;;  %v1712_v34 = vsub.f32 %v5036_v10, %v6074_v8  ;;  %v6071_v3 = vand.u32 4294901760, %v5045_v59  ;;  %3676 = vmatpush3.bf16.msk.msra.mxu0 %vm4599_vm7, %v6138_v53  ;;  %3582 = vmatprep.subr.bf16.mxu1 %v4867_v6 }
  0x98   :  { %6221 = vst [vmem:[#allocation25_spill] sm:$0xff] %v5195_v45  ;;  %v5213_v12 = vpack.c.bf16 %v996_v24, %v990_v31  ;;  %v5219_v17 = vpack.c.bf16 %v1707_v37, %v1701_v39  ;;  %v1008_v40 = vand.u32 4294901760, %v1007_v20  ;;  %v6072_v45 = vand.u32 4294901760, %v5059_v38  ;;  %3678 = vmatprep.subr.msk.bf16.mxu0 %vm4643_vm9, %v6138_v53 }
  0x99   :  { %v1718_v56 = vsub.f32 %v5043_v22, %v6073_v13  ;;  %v1713_v25 = vand.u32 4294901760, %v1712_v34  ;;  %v1013_v31 = vsub.f32 %v5045_v59, %v6071_v3  ;;  %v6081_v24 = vand.u32 4294901760, %v5061_v28 }
  0x9a   :  { %v6080_v1 = vand.u32 4294901760, %v5078_v36  ;;  %v5236_v37 = vsub.f32 %v5028_v30, %v5028_v30  ;;  %v5238_v39 = vpack.c.bf16 %v1008_v40, %v1002_v42  ;;  %v1019_v34 = vsub.f32 %v5059_v38, %v6072_v45  ;;  %3584 = vmatpush3.bf16.msra.mxu1 %v4867_v6 }
  0x9b   :  { %v1719_v20 = vand.u32 4294901760, %v1718_v56  ;;  %v1014_v4 = vand.u32 4294901760, %v1013_v31  ;;  %v1724_v23 = vsub.f32 %v5061_v28, %v6081_v24  ;;  %v6077_v30 = vand.u32 4294901760, %v5080_v54  ;;  %3680 = vmatpush3.bf16.msk.msra.mxu0 %vm4643_vm9, %v6138_v53 }
  0x9c   :  { %6223 = vst [vmem:[#allocation27_spill] sm:$0xff] %v5238_v39  ;;  %v1730_v40 = vsub.f32 %v5078_v36, %v6080_v1  ;;  %v1020_v42 = vand.u32 4294901760, %v1019_v34  ;;  %v6076_v45 = vand.u32 4294901760, %v5090_v49  ;;  %v6079_v39 = vand.u32 4294901760, %v5092_v16  ;;  %3682 = vmatprep.subr.msk.bf16.mxu0 %vm4680_vm10, %v6138_v53 }
  0x9d   :  { %v5254_v56 = vpack.c.bf16 %v1719_v20, %v1713_v25  ;;  %v1725_v13 = vand.u32 4294901760, %v1724_v23  ;;  %v1025_v31 = vsub.f32 %v5080_v54, %v6077_v30  ;;  %v3585_v25 = vpack.c.bf16 %v4607_v33, %v4605_v32 }
  0x9e   :  { %v1731_v8 = vand.u32 4294901760, %v1730_v40  ;;  %v5267_v20 = vpack.c.bf16 %v1020_v42, %v1014_v4  ;;  %v1031_v34 = vsub.f32 %v5090_v49, %v6076_v45  ;;  %v6078_v23 = vand.u32 4294901760, %v5236_v37 }
  0x9f   :  { %v5279_v46 = vsub.f32 %v5082_v11, %v5115_v19  ;;  %v1026_v32 = vand.u32 4294901760, %v1025_v31  ;;  %v1736_v33 = vsub.f32 %v5092_v16, %v6079_v39  ;;  %v5291_v45 = vpack.c.bf16 %v4880_v7, %v4869_v48  ;;  %3586 = vmatprep.subr.bf16.mxu1 %v3585_v25  ;;  %3684 = vmatpush3.bf16.msk.msra.mxu0 %vm4680_vm10, %v6138_v53 }
  0xa0   :  { %v5281_v3 = vpack.c.bf16 %v1731_v8, %v1725_v13  ;;  %v1032_v4 = vand.u32 4294901760, %v1031_v34  ;;  %v1742_v42 = vsub.f32 %v5236_v37, %v6078_v23  ;;  %v5295_v11 = vpack.c.bf16 %v4897_v5, %v4887_v29  ;;  %3588 = vmatpush3.bf16.msra.mxu1 %v3585_v25  ;;  %3878 = vmatprep.subr.msk.bf16.mxu0 %vm4794_vm1, %v6138_v53 }
  0xa1   :  { %v1737_v30 = vand.u32 4294901760, %v1736_v33  ;;  %v5299_v8 = vpack.c.bf16 %v4910_v9, %v4899_v55  ;;  %v5309_v34 = vpack.c.bf16 %v4929_v26, %v4919_v2  ;;  %v5317_v6 = vpack.c.bf16 %v4940_v27, %v4931_v52  ;;  %3686 = vmatprep.subr.msk.bf16.mxu1 %vm4780_vm0, %v6138_v53 }
  0xa2   :  { %v5305_v13 = vpack.c.bf16 %v1032_v4, %v1026_v32  ;;  %v1743_v31 = vand.u32 4294901760, %v1742_v42  ;;  %v5321_v40 = vpack.c.bf16 %v4961_v14, %v4949_v43  ;;  %v5325_v32 = vpack.c.bf16 %v4972_v60, %v4963_v15  ;;  %3032 = vmatmul.mubr.f32.vlgmr.msra.gmra.mrb[0].mxu0 %v6209_v58 }
  0xa3   :  { %v5331_v42 = vpack.c.bf16 %v4991_v47, %v4979_v50  ;;  %v5335_v23 = vpack.c.bf16 %v5004_v61, %v4993_v41  ;;  %v5339_v39 = vpack.c.bf16 %v5021_v44, %v5011_v51  ;;  %v5343_v1 = vpack.c.bf16 %v5025_v63, %v5023_v0  ;;  %3880 = vmatpush3.bf16.msk.msra.mxu0 %vm4794_vm1, %v6138_v53 }
  0xa4   :  { %6226 = vst [vmem:[#allocation31_spill] sm:$0xff] %v5325_v32  ;;  %v5327_v4 = vpack.c.bf16 %v1743_v31, %v1737_v30  ;;  %v5347_v30 = vpack.c.bf16 %v5043_v22, %v5036_v10  ;;  %v5351_v31 = vpack.c.bf16 %v5059_v38, %v5045_v59  ;;  %v5358_v24 = vpack.c.bf16 %v5078_v36, %v5061_v28  ;;  %v6243_v32 = vld [vmem:[#allocation28_spill] sm:$0xff] }
  0xa5   :  { %6227 = vst [vmem:[#allocation33_spill] sm:$0xff] %v5331_v42  ;;  %6228 = vst [vmem:[#allocation50_spill] sm:$0xff] %v5335_v23  ;;  %v5362_v33 = vpack.c.bf16 %v5090_v49, %v5080_v54  ;;  %2918 = vmatmul.mubr.f32.vlgmr.msra.gmra.mrb[0].mxu1 %v6243_v32  ;;  %v6244_v48 = vand.u32 4294901760, %v4899_v55  ;;  %3034 = vmatprep.mubr.f32.mxu0 %v4688_v18  ;;  %v6252_v55 = vld [vmem:[#allocation44_spill] sm:$0xff] }
  0xa6   :  { %6229 = vst [vmem:[#allocation51_spill] sm:$0xff] %v5339_v39  ;;  %6230 = vst [vmem:[#allocation52_spill] sm:$0xff] %v5343_v1  ;;  %v6241_v39 = vand.u32 4294901760, %v4897_v5  ;;  %3688 = vmatpush3.bf16.msk.msra.mxu1 %vm4780_vm0, %v6138_v53  ;;  %v6246_v5 = vld [vmem:[#allocation35_spill] sm:$0xff]  ;;  %vm6253_vm5 = vnez %v6252_v55  ;;  %3035 = vmatmul.mubr.f32.gmra.mrb[2].mxu0 %v4707_v62 }
  0xa7   :  { %6231 = vst [vmem:[#allocation53_spill] sm:$0xff] %v5347_v30  ;;  %6232 = vst [vmem:[#allocation54_spill] sm:$0xff] %v5351_v31  ;;  %v5366_v30 = vpack.c.bf16 %v5236_v37, %v5092_v16  ;;  %2920 = vmatprep.mubr.f32.mxu1 %v6246_v5  ;;  %3882 = vmatprep.subr.msk.bf16.mxu0 %vm6253_vm5, %v6138_v53 }
  0xa8   :  { %6233 = vst [vmem:[#allocation55_spill] sm:$0xff] %v5358_v24  ;;  %6234 = vst [vmem:[#allocation56_spill] sm:$0xff] %v5362_v33  ;;  %v6239_v24 = vand.u32 4294901760, %v4880_v7  ;;  %v6240_v33 = vand.u32 4294901760, %v4887_v29  ;;  %v6245_v7 = vand.u32 4294901760, %v4910_v9  ;;  %3884 = vmatpush3.bf16.msk.msra.mxu0 %vm6253_vm5, %v6138_v53 }
  0xa9   :  { %6235 = vst [vmem:[#allocation57_spill] sm:$0xff] %v5366_v30  ;;  %v6242_v30 = vand.u32 4294901760, %v5279_v46 }
  0xaa   :  { %v5378_v31 = vpack.c.bf16 %v6239_v24, %v6238_v21  ;;  %v5384_v23 = vpack.c.bf16 %v6241_v39, %v6240_v33  ;;  %v5401_v29 = vpack.c.bf16 %v6245_v7, %v6244_v48  ;;  %v6247_v24 = vand.u32 4294901760, %v4919_v2  ;;  %v6254_v21 = vld [vmem:[#allocation37_spill] sm:$0xff]  ;;  %v6260_v7 = vld [vmem:[#allocation46_spill] sm:$0xff] }
  0xab   :  { %v901_v42 = vsub.f32 %v5279_v46, %v6242_v30  ;;  %v6248_v39 = vand.u32 4294901760, %v4929_v26  ;;  %v6250_v30 = vld [vmem:[#allocation43_spill] sm:$0xff]  ;;  %2921 = vmatmul.mubr.f32.gmra.mrb[2].mxu1 %v6254_v21  ;;  %v6255_v2 = vand.u32 4294901760, %v4931_v52  ;;  %v6256_v26 = vand.u32 4294901760, %v4940_v27  ;;  %v6265_v52 = vld [vmem:[#allocation32_spill] sm:$0xff] }
  0xac   :  { %vm6251_vm4 = vnez %v6250_v30  ;;  %vm6261_vm14 = vnez %v6260_v7  ;;  %3297 = vmatprep.mubr.f32.mxu0 %v6265_v52  ;;  %v65_v27 = vld [vmem:[#allocation7 + $0x8] sm:$0xff] }
  0xad   :  { %v5409_v33 = vpack.c.bf16 %v6248_v39, %v6247_v24  ;;  %3690 = vmatprep.subr.msk.bf16.mxu1 %vm6251_vm4, %v6138_v53  ;;  %v902_v9 = vand.u32 4294901760, %v901_v42  ;;  %v5429_v48 = vpack.c.bf16 %v6256_v26, %v6255_v2  ;;  %v6258_v42 = vld [vmem:[#allocation45_spill] sm:$0xff]  ;;  %3886 = vmatprep.subr.msk.bf16.mxu0 %vm6261_vm14, %v6138_v53  ;;  %v6262_v24 = vand.u32 4294901760, %v4949_v43 }
  0xae   :  { %3692 = vmatpush3.bf16.msk.msra.mxu1 %vm6251_vm4, %v6138_v53  ;;  %vm6259_vm8 = vnez %v6258_v42  ;;  %v6263_v39 = vand.u32 4294901760, %v4961_v14  ;;  %3888 = vmatpush3.bf16.msk.msra.mxu0 %vm6261_vm14, %v6138_v53  ;;  %v6266_v2 = vand.u32 4294901760, %v4963_v15  ;;  %v6267_v43 = vand.u32 4294901760, %v4972_v60  ;;  %v6269_v14 = vld [vmem:[#allocation47_spill] sm:$0xff]  ;;  %v66_v15 = vld [vmem:[#allocation7 + $0x10] sm:$0xff] }
  0xaf   :  { %6249 = vst [vmem:[#allocation41_spill] sm:$0xff] %v5409_v33  ;;  %6257 = vst [vmem:[#allocation42_spill] sm:$0xff] %v5429_v48  ;;  %3694 = vmatprep.subr.msk.bf16.mxu1 %vm6259_vm8, %v6138_v53  ;;  %3069 = vmatprep.mubr.f32.mxu1 %v902_v9  ;;  %vm6270_vm3 = vnez %v6269_v14  ;;  %v6271_v9 = vld [vmem:[#allocation48_spill] sm:$0xff]  ;;  %v67_v60 = vld [vmem:[#allocation7 + $0x18] sm:$0xff]  ;;  %v5494_v48 = vand.u32 4294901760, %v66_v15 }
  0xb0   :  { %v5441_v33 = vpack.c.bf16 %v6263_v39, %v6262_v24  ;;  %v5454_v26 = vpack.c.bf16 %v6267_v43, %v6266_v2  ;;  %vm6272_vm7 = vnez %v6271_v9  ;;  %v6273_v24 = vand.u32 4294901760, %v4979_v50 }
  0xb1   :  { %3890 = vmatprep.subr.msk.bf16.mxu0 %vm6272_vm7, %v6138_v53  ;;  %v6274_v39 = vand.u32 4294901760, %v4991_v47  ;;  %v6276_v2 = vand.u32 4294901760, %v4993_v41  ;;  %v6277_v50 = vand.u32 4294901760, %v5004_v61  ;;  %v6278_v47 = vld [vmem:[#allocation13_spill] sm:$0xff]  ;;  %v5499_v61 = vand.u32 4294901760, %v67_v60 }
  0xb2   :  { %6264 = vst [vmem:[#allocation28_spill] sm:$0xff] %v5441_v33  ;;  %3696 = vmatpush3.bf16.msk.msra.mxu1 %vm6259_vm8, %v6138_v53  ;;  %6268 = vst [vmem:[#allocation35_spill] sm:$0xff] %v5454_v26  ;;  %v5468_v33 = vand.u32 4294901760, %v65_v27  ;;  %3892 = vmatpush3.bf16.msk.msra.mxu0 %vm6272_vm7, %v6138_v53  ;;  %vm6279_vm9 = vnez %v6278_v47 }
  0xb3   :  { %3698 = vmatprep.subr.msk.bf16.mxu1 %vm6270_vm3, %v6138_v53  ;;  %v5466_v52 = vpack.c.bf16 %v6274_v39, %v6273_v24  ;;  %v5480_v43 = vpack.c.bf16 %v6277_v50, %v6276_v2  ;;  %v6280_v24 = vld [vmem:[#allocation14_spill] sm:$0xff]  ;;  %v6282_v39 = vand.u32 4294901760, %v5011_v51  ;;  %v6285_v51 = vand.u32 4294901760, %v5023_v0  ;;  %v6287_v2 = vld [vmem:[#allocation16_spill] sm:$0xff] }
  0xb4   :  { %vm6281_vm10 = vnez %v6280_v24  ;;  %v5497_v41 = vsub.f32 %v65_v27, %v5468_v33  ;;  %vm6288_vm11 = vnez %v6287_v2  ;;  %v6289_v27 = vld [vmem:[#allocation17_spill] sm:$0xff]  ;;  %v6291_v50 = vand.u32 4294901760, %v5036_v10 }
  0xb5   :  { %6275 = vst [vmem:[#allocation43_spill] sm:$0xff] %v5466_v52  ;;  %3894 = vmatprep.subr.msk.bf16.mxu0 %vm6281_vm10, %v6138_v53  ;;  %v6283_v52 = vand.u32 4294901760, %v5021_v44  ;;  %v6286_v44 = vand.u32 4294901760, %v5025_v63  ;;  %vm6290_vm13 = vnez %v6289_v27  ;;  %v5526_v0 = vsub.f32 %v66_v15, %v5494_v48  ;;  %v6296_v15 = vld [vmem:[#allocation18_spill] sm:$0xff] }
  0xb6   :  { %3700 = vmatpush3.bf16.msk.msra.mxu1 %vm6270_vm3, %v6138_v53  ;;  %3896 = vmatpush3.bf16.msk.msra.mxu0 %vm6281_vm10, %v6138_v53  ;;  %v6293_v10 = vand.u32 4294901760, %v5045_v59  ;;  %vm6297_vm6 = vnez %v6296_v15  ;;  %v6310_v59 = vand.u32 4294901760, %v5236_v37  ;;  %v6315_v37 = vld [vmem:[#allocation24_spill] sm:$0xff] }
  0xb7   :  { %3702 = vmatprep.subr.msk.bf16.mxu1 %vm6279_vm9, %v6138_v53  ;;  %v5492_v26 = vpack.c.bf16 %v6283_v52, %v6282_v39  ;;  %v5511_v52 = vpack.c.bf16 %v6286_v44, %v6285_v51  ;;  %3898 = vmatprep.subr.msk.bf16.mxu0 %vm6290_vm13, %v6138_v53  ;;  %v6292_v39 = vand.u32 4294901760, %v5043_v22  ;;  %v5530_v51 = vsub.f32 %v67_v60, %v5499_v61  ;;  %v6298_v60 = vld [vmem:[#allocation19_spill] sm:$0xff] }
  0xb8   :  { %v6294_v22 = vand.u32 4294901760, %v5059_v38  ;;  %vm6299_vm12 = vnez %v6298_v60  ;;  %v6303_v38 = vand.u32 4294901760, %v5497_v41 }
  0xb9   :  { %6284 = vst [vmem:[#allocation44_spill] sm:$0xff] %v5492_v26  ;;  %v5523_v26 = vpack.c.bf16 %v6292_v39, %v6291_v50  ;;  %v6300_v50 = vand.u32 4294901760, %v5061_v28  ;;  %v6301_v39 = vand.u32 4294901760, %v5078_v36  ;;  %v6304_v28 = vand.u32 4294901760, %v5080_v54 }
  0xba   :  { %3704 = vmatpush3.bf16.msk.msra.mxu1 %vm6279_vm9, %v6138_v53  ;;  %3900 = vmatpush3.bf16.msk.msra.mxu0 %vm6290_vm13, %v6138_v53  ;;  %v5542_v44 = vpack.c.bf16 %v6294_v22, %v6293_v10  ;;  %v911_v10 = vsub.f32 %v5497_v41, %v6303_v38  ;;  %v6305_v36 = vand.u32 4294901760, %v5090_v49  ;;  %v6309_v22 = vand.u32 4294901760, %v5092_v16  ;;  %v6314_v16 = vld [vmem:[#allocation12_spill] sm:$0xff] }
  0xbb   :  { %3706 = vmatprep.subr.msk.bf16.mxu1 %vm6288_vm11, %v6138_v53  ;;  %3902 = vmatprep.subr.msk.bf16.mxu0 %vm6299_vm12, %v6138_v53  ;;  %v5554_v63 = vpack.c.bf16 %v6301_v39, %v6300_v50  ;;  %v6312_v54 = vand.u32 4294901760, %v5526_v0 }
  0xbc   :  { %6295 = vst [vmem:[#allocation37_spill] sm:$0xff] %v5542_v44  ;;  %v5571_v50 = vpack.c.bf16 %v6305_v36, %v6304_v28  ;;  %v912_v28 = vand.u32 4294901760, %v911_v10  ;;  %v6313_v36 = vand.u32 4294901760, %v5530_v51  ;;  %v6320_v44 = vld [vmem:[#allocation40_spill] sm:$0xff] }
  0xbd   :  { %6302 = vst [vmem:[#allocation45_spill] sm:$0xff] %v5554_v63  ;;  %v5583_v63 = vpack.c.bf16 %v6310_v59, %v6309_v22  ;;  %v921_v49 = vsub.f32 %v5526_v0, %v6312_v54  ;;  %v6316_v22 = vld [vmem:[#allocation34_spill] sm:$0xff]  ;;  %v6317_v54 = vld [vmem:[#allocation49_spill] sm:$0xff] }
  0xbe   :  { %3708 = vmatpush3.bf16.msk.msra.mxu1 %vm6288_vm11, %v6138_v53  ;;  %3904 = vmatpush3.bf16.msk.msra.mxu0 %vm6299_vm12, %v6138_v53  ;;  %6306 = vst [vmem:[#allocation46_spill] sm:$0xff] %v5571_v50  ;;  %v931_v50 = vsub.f32 %v5530_v51, %v6313_v36  ;;  %v6318_v36 = vld [vmem:[#allocation15_spill] sm:$0xff] }
  0xbf   :  { %3710 = vmatprep.subr.msk.bf16.mxu1 %vm6297_vm6, %v6138_v53  ;;  %3906 = vmatprep.subr.msk.bf16.mxu0 %vm5030_vm15, %v6138_v53  ;;  %6311 = vst [vmem:[#allocation32_spill] sm:$0xff] %v5583_v63  ;;  %v922_v59 = vand.u32 4294901760, %v921_v49  ;;  %v6319_v63 = vld [vmem:[#allocation39_spill] sm:$0xff]  ;;  %v6323_v49 = vld [vmem:[#allocation25_spill] sm:$0xff] }
  0xc0   :  { %v932_v10 = vand.u32 4294901760, %v931_v50  ;;  %v6321_v50 = vld [vmem:[#allocation23_spill] sm:$0xff] }
  0xc2   :  { %3712 = vmatpush3.bf16.msk.msra.mxu1 %vm6297_vm6, %v6138_v53  ;;  %3908 = vmatpush3.bf16.msk.msra.mxu0 %vm5030_vm15, %v6138_v53 }
  0xc3   :  { %3714 = vmatprep.subr.msk.bf16.mxu1 %vm5014_vm2, %v6138_v53  ;;  %3910 = vmatprep.subr.bf16.mxu0 %v6315_v37 }
  0xc5   :  { %3298 = vmatmul.mubr.f32.vlgmr.msra.gmra.mrb[4].mxu0 %v6316_v22 }
  0xc6   :  { %3716 = vmatpush3.bf16.msk.msra.mxu1 %vm5014_vm2, %v6138_v53  ;;  %3912 = vmatpush3.bf16.msra.mxu0 %v6315_v37  ;;  %v6352_v37 = vld [vmem:[#allocation46_spill] sm:$0xff] }
  0xc7   :  { %3718 = vmatprep.subr.bf16.mxu1 %v6314_v16  ;;  %3914 = vmatprep.subr.bf16.mxu0 %v6318_v36 }
  0xc8   :  { %3300 = vmatprep.mubr.f32.mxu0 %v6319_v63  ;;  %v6322_v63 = vld [vmem:[#allocation22_spill] sm:$0xff] }
  0xc9   :  { %3070 = vmatmul.mubr.f32.vlgmr.msra.gmra.mrb[4].mxu1 %v912_v28  ;;  %3301 = vmatmul.mubr.f32.gmra.mrb[6].mxu0 %v6320_v44  ;;  %v6324_v44 = vld [vmem:[#allocation27_spill] sm:$0xff]  ;;  %v6350_v28 = vld [vmem:[#allocation37_spill] sm:$0xff] }
  0xca   :  { %3720 = vmatpush3.bf16.msra.mxu1 %v6314_v16  ;;  %3072 = vmatprep.mubr.f32.mxu1 %v922_v59  ;;  %v6351_v16 = vld [vmem:[#allocation45_spill] sm:$0xff] }
  0xcb   :  { %3722 = vmatprep.subr.bf16.mxu1 %v6317_v54  ;;  %3916 = vmatpush3.bf16.msra.mxu0 %v6318_v36 }
  0xcc   :  { %3918 = vmatprep.subr.bf16.mxu0 %v5163_v57  ;;  %3335 = vmatprep.mubr.f32.mxu0 %v6321_v50 }
  0xcd   :  { %3073 = vmatmul.mubr.f32.gmra.mrb[6].mxu1 %v932_v10 }
  0xce   :  { %3724 = vmatpush3.bf16.msra.mxu1 %v6317_v54  ;;  %3107 = vmatprep.mubr.f32.mxu1 %v5115_v19 }
  0xcf   :  { %3726 = vmatprep.subr.bf16.mxu1 %v5157_v35  ;;  %3920 = vmatpush3.bf16.msra.mxu0 %v5163_v57  ;;  %v6326_v57 = vld [vmem:[#allocation31_spill] sm:$0xff] }
  0xd0   :  { %3922 = vmatprep.subr.bf16.mxu0 %v6323_v49 }
  0xd2   :  { %3728 = vmatpush3.bf16.msra.mxu1 %v5157_v35  ;;  %v6325_v35 = vld [vmem:[#allocation26_spill] sm:$0xff] }
  0xd3   :  { %3730 = vmatprep.subr.bf16.mxu1 %v6322_v63  ;;  %3924 = vmatpush3.bf16.msra.mxu0 %v6323_v49 }
  0xd4   :  { %3926 = vmatprep.subr.bf16.mxu0 %v5219_v17 }
  0xd6   :  { %3732 = vmatpush3.bf16.msra.mxu1 %v6322_v63 }
  0xd7   :  { %3734 = vmatprep.subr.bf16.mxu1 %v5213_v12  ;;  %3928 = vmatpush3.bf16.msra.mxu0 %v5219_v17  ;;  %v6329_v17 = vld [vmem:[#allocation51_spill] sm:$0xff] }
  0xd8   :  { %3930 = vmatprep.subr.bf16.mxu0 %v5254_v56 }
  0xda   :  { %3736 = vmatpush3.bf16.msra.mxu1 %v5213_v12  ;;  %v6327_v12 = vld [vmem:[#allocation33_spill] sm:$0xff] }
  0xdb   :  { %3738 = vmatprep.subr.bf16.mxu1 %v6324_v44  ;;  %3932 = vmatpush3.bf16.msra.mxu0 %v5254_v56  ;;  %v6330_v56 = vld [vmem:[#allocation52_spill] sm:$0xff] }
  0xdc   :  { %3934 = vmatprep.subr.bf16.mxu0 %v5281_v3 }
  0xde   :  { %3740 = vmatpush3.bf16.msra.mxu1 %v6324_v44 }
  0xdf   :  { %3742 = vmatprep.subr.bf16.mxu1 %v5267_v20  ;;  %3936 = vmatpush3.bf16.msra.mxu0 %v5281_v3  ;;  %v6332_v3 = vld [vmem:[#allocation54_spill] sm:$0xff] }
  0xe0   :  { %3938 = vmatprep.subr.bf16.mxu0 %v5327_v4 }
  0xe2   :  { %3744 = vmatpush3.bf16.msra.mxu1 %v5267_v20  ;;  %v6331_v20 = vld [vmem:[#allocation53_spill] sm:$0xff] }
  0xe3   :  { %3746 = vmatprep.subr.bf16.mxu1 %v5305_v13  ;;  %3940 = vmatpush3.bf16.msra.mxu0 %v5327_v4  ;;  %v6341_v4 = vand.u32 4294901760, %v5526_v0 }
  0xe4   :  { %3942 = vmatprep.subr.bf16.mxu0 %v5295_v11 }
  0xe6   :  { %3748 = vmatpush3.bf16.msra.mxu1 %v5305_v13  ;;  %3336 = vmatmul.mubr.f32.vlgmr.msra.gmra.mrb[4].mxu0 %v6209_v58  ;;  %v6335_v13 = vld [vmem:[#allocation57_spill] sm:$0xff] }
  0xe7   :  { %3750 = vmatprep.subr.bf16.mxu1 %v5291_v45  ;;  %3944 = vmatpush3.bf16.msra.mxu0 %v5295_v11  ;;  %v6333_v11 = vld [vmem:[#allocation55_spill] sm:$0xff] }
  0xe8   :  { %3946 = vmatprep.subr.bf16.mxu0 %v5309_v34  ;;  %3338 = vmatprep.mubr.f32.mxu0 %v4688_v18 }
  0xe9   :  { %3108 = vmatmul.mubr.f32.vlgmr.msra.gmra.mrb[4].mxu1 %v5468_v33 }
  0xea   :  { %3752 = vmatpush3.bf16.msra.mxu1 %v5291_v45  ;;  %3110 = vmatprep.mubr.f32.mxu1 %v5494_v48  ;;  %v6328_v45 = vld [vmem:[#allocation50_spill] sm:$0xff] }
  0xeb   :  { %3754 = vmatprep.subr.bf16.mxu1 %v5299_v8  ;;  %3339 = vmatmul.mubr.f32.gmra.mrb[6].mxu0 %v4707_v62 }
  0xec   :  { %3948 = vmatpush3.bf16.msra.mxu0 %v5309_v34  ;;  %3373 = vmatprep.mubr.f32.mxu0 %v6325_v35  ;;  %v6336_v34 = vand.u32 4294901760, %v5279_v46 }
  0xed   :  { %3111 = vmatmul.mubr.f32.gmra.mrb[6].mxu1 %v5499_v61  ;;  %3950 = vmatprep.subr.bf16.mxu0 %v5321_v40 }
  0xee   :  { %3756 = vmatpush3.bf16.msra.mxu1 %v5299_v8  ;;  %3145 = vmatprep.mubr.f32.mxu1 %v5279_v46  ;;  %v6334_v8 = vld [vmem:[#allocation56_spill] sm:$0xff]  ;;  %v6338_v46 = vand.u32 4294901760, %v5497_v41 }
  0xef   :  { %3758 = vmatprep.subr.bf16.mxu1 %v5317_v6 }
  0xf0   :  { %3952 = vmatpush3.bf16.msra.mxu0 %v5321_v40  ;;  %v6339_v40 = vld [vmem:[#allocation30_spill] sm:$0xff] }
  0xf1   :  { %3954 = vmatprep.subr.bf16.mxu0 %v6327_v12 }
  0xf2   :  { %3760 = vmatpush3.bf16.msra.mxu1 %v5317_v6  ;;  %v6337_v6 = vld [vmem:[#allocation29_spill] sm:$0xff] }
  0xf3   :  { %3762 = vmatprep.subr.bf16.mxu1 %v6326_v57 }
  0xf4   :  { %3956 = vmatpush3.bf16.msra.mxu0 %v6327_v12 }
  0xf5   :  { %3958 = vmatprep.subr.bf16.mxu0 %v6329_v17 }
  0xf6   :  { %3764 = vmatpush3.bf16.msra.mxu1 %v6326_v57 }
  0xf7   :  { %3766 = vmatprep.subr.bf16.mxu1 %v6328_v45 }
  0xf8   :  { %3960 = vmatpush3.bf16.msra.mxu0 %v6329_v17 }
  0xf9   :  { %3962 = vmatprep.subr.bf16.mxu0 %v6331_v20 }
  0xfa   :  { %3768 = vmatpush3.bf16.msra.mxu1 %v6328_v45 }
  0xfb   :  { %3770 = vmatprep.subr.bf16.mxu1 %v6330_v56 }
  0xfc   :  { %3964 = vmatpush3.bf16.msra.mxu0 %v6331_v20 }
  0xfd   :  { %3966 = vmatprep.subr.bf16.mxu0 %v6333_v11 }
  0xfe   :  { %3772 = vmatpush3.bf16.msra.mxu1 %v6330_v56 }
  0xff   :  { %3774 = vmatprep.subr.bf16.mxu1 %v6332_v3 }
 0x100   :  { %3968 = vmatpush3.bf16.msra.mxu0 %v6333_v11 }
 0x101   :  { %3970 = vmatprep.subr.bf16.mxu0 %v6335_v13 }
 0x102   :  { %3776 = vmatpush3.bf16.msra.mxu1 %v6332_v3 }
 0x103   :  { %3778 = vmatprep.subr.bf16.mxu1 %v6334_v8 }
 0x104   :  { %3972 = vmatpush3.bf16.msra.mxu0 %v6335_v13 }
 0x105   :  { %3974 = vmatprep.subr.msk.bf16.mxu0 %vm4794_vm1, %v6138_v53 }
 0x106   :  { %3780 = vmatpush3.bf16.msra.mxu1 %v6334_v8 }
 0x107   :  { %3782 = vmatprep.subr.msk.bf16.mxu1 %vm4780_vm0, %v6138_v53  ;;  %3374 = vmatmul.mubr.f32.vlgmr.msra.gmra.mrb[4].mxu0 %v6243_v32  ;;  %v6340_v32 = vld [vmem:[#allocation41_spill] sm:$0xff] }
 0x108   :  { %3976 = vmatpush3.bf16.msk.msra.mxu0 %vm4794_vm1, %v6138_v53  ;;  %3376 = vmatprep.mubr.f32.mxu0 %v6246_v5  ;;  %v6342_v5 = vld [vmem:[#allocation36_spill] sm:$0xff] }
 0x109   :  { %3146 = vmatmul.mubr.f32.vlgmr.msra.gmra.mrb[4].mxu1 %v5497_v41  ;;  %3978 = vmatprep.subr.msk.bf16.mxu0 %vm6253_vm5, %v6138_v53  ;;  %v6344_v41 = vld [vmem:[#allocation38_spill] sm:$0xff] }
 0x10a   :  { %3784 = vmatpush3.bf16.msk.msra.mxu1 %vm4780_vm0, %v6138_v53  ;;  %3148 = vmatprep.mubr.f32.mxu1 %v5526_v0  ;;  %v6347_v0 = vld [vmem:[#allocation35_spill] sm:$0xff] }
 0x10b   :  { %3786 = vmatprep.subr.msk.bf16.mxu1 %vm6251_vm4, %v6138_v53  ;;  %3377 = vmatmul.mubr.f32.gmra.mrb[6].mxu0 %v6254_v21  ;;  %v6343_v21 = vand.u32 4294901760, %v5530_v51 }
 0x10c   :  { %3980 = vmatpush3.bf16.msk.msra.mxu0 %vm6253_vm5, %v6138_v53  ;;  %3411 = vmatprep.mubr.f32.mxu0 %v6337_v6 }
 0x10d   :  { %3149 = vmatmul.mubr.f32.gmra.mrb[6].mxu1 %v5530_v51  ;;  %3982 = vmatprep.subr.msk.bf16.mxu0 %vm6261_vm14, %v6138_v53  ;;  %v6348_v51 = vld [vmem:[#allocation43_spill] sm:$0xff] }
 0x10e   :  { %3788 = vmatpush3.bf16.msk.msra.mxu1 %vm6251_vm4, %v6138_v53  ;;  %3183 = vmatprep.mubr.f32.mxu1 %v6336_v34 }
 0x10f   :  { %3790 = vmatprep.subr.msk.bf16.mxu1 %vm6259_vm8, %v6138_v53 }
 0x110   :  { %3984 = vmatpush3.bf16.msk.msra.mxu0 %vm6261_vm14, %v6138_v53 }
 0x111   :  { %3986 = vmatprep.subr.msk.bf16.mxu0 %vm6272_vm7, %v6138_v53 }
 0x112   :  { %3792 = vmatpush3.bf16.msk.msra.mxu1 %vm6259_vm8, %v6138_v53 }
 0x113   :  { %3794 = vmatprep.subr.msk.bf16.mxu1 %vm6270_vm3, %v6138_v53 }
 0x114   :  { %3988 = vmatpush3.bf16.msk.msra.mxu0 %vm6272_vm7, %v6138_v53 }
 0x115   :  { %3990 = vmatprep.subr.msk.bf16.mxu0 %vm6281_vm10, %v6138_v53 }
 0x116   :  { %3796 = vmatpush3.bf16.msk.msra.mxu1 %vm6270_vm3, %v6138_v53 }
 0x117   :  { %3798 = vmatprep.subr.msk.bf16.mxu1 %vm6279_vm9, %v6138_v53 }
 0x118   :  { %3992 = vmatpush3.bf16.msk.msra.mxu0 %vm6281_vm10, %v6138_v53 }
 0x119   :  { %3994 = vmatprep.subr.msk.bf16.mxu0 %vm6290_vm13, %v6138_v53 }
 0x11a   :  { %3800 = vmatpush3.bf16.msk.msra.mxu1 %vm6279_vm9, %v6138_v53 }
 0x11b   :  { %3802 = vmatprep.subr.msk.bf16.mxu1 %vm6288_vm11, %v6138_v53 }
 0x11c   :  { %3996 = vmatpush3.bf16.msk.msra.mxu0 %vm6290_vm13, %v6138_v53 }
 0x11d   :  { %3998 = vmatprep.subr.msk.bf16.mxu0 %vm6299_vm12, %v6138_v53 }
 0x11e   :  { %3804 = vmatpush3.bf16.msk.msra.mxu1 %vm6288_vm11, %v6138_v53 }
 0x11f   :  { %3806 = vmatprep.subr.msk.bf16.mxu1 %vm6297_vm6, %v6138_v53 }
 0x120   :  { %4000 = vmatpush3.bf16.msk.msra.mxu0 %vm6299_vm12, %v6138_v53 }
 0x121   :  { %4002 = vmatprep.subr.msk.bf16.mxu0 %vm5030_vm15, %v6138_v53 }
 0x122   :  { %3808 = vmatpush3.bf16.msk.msra.mxu1 %vm6297_vm6, %v6138_v53 }
 0x123   :  { %3810 = vmatprep.subr.msk.bf16.mxu1 %vm5014_vm2, %v6138_v53 }
 0x124   :  { %4004 = vmatpush3.bf16.msk.msra.mxu0 %vm5030_vm15, %v6138_v53 }
 0x125   :  { %4006 = vmatprep.subr.bf16.mxu0 %v5384_v23 }
 0x126   :  { %3812 = vmatpush3.bf16.msk.msra.mxu1 %vm5014_vm2, %v6138_v53 }
 0x127   :  { %3814 = vmatprep.subr.bf16.mxu1 %v5378_v31  ;;  %3412 = vmatmul.mubr.f32.vlgmr.msra.gmra.mrb[4].mxu0 %v6339_v40 }
 0x128   :  { %4008 = vmatpush3.bf16.msra.mxu0 %v5384_v23  ;;  %3414 = vmatprep.mubr.f32.mxu0 %v6342_v5  ;;  %v6346_v23 = vld [vmem:[#allocation28_spill] sm:$0xff] }
 0x129   :  { %3184 = vmatmul.mubr.f32.vlgmr.msra.gmra.mrb[4].mxu1 %v6338_v46  ;;  %4010 = vmatprep.subr.bf16.mxu0 %v6340_v32 }
 0x12a   :  { %3816 = vmatpush3.bf16.msra.mxu1 %v5378_v31  ;;  %3186 = vmatprep.mubr.f32.mxu1 %v6341_v4  ;;  %v6345_v31 = vld [vmem:[#allocation42_spill] sm:$0xff] }
 0x12b   :  { %3818 = vmatprep.subr.bf16.mxu1 %v5401_v29  ;;  %3415 = vmatmul.mubr.f32.gmra.mrb[6].mxu0 %v6344_v41 }
 0x12c   :  { %4012 = vmatpush3.bf16.msra.mxu0 %v6340_v32  ;;  %3449 = vmatprep.mubr.f32.mxu0 %v6321_v50 }
 0x12d   :  { %3187 = vmatmul.mubr.f32.gmra.mrb[6].mxu1 %v6343_v21  ;;  %4014 = vmatprep.subr.bf16.mxu0 %v6346_v23 }
 0x12e   :  { %3820 = vmatpush3.bf16.msra.mxu1 %v5401_v29  ;;  %3221 = vmatprep.mubr.f32.mxu1 %v5115_v19  ;;  %v6349_v29 = vld [vmem:[#allocation44_spill] sm:$0xff] }
 0x12f   :  { %3822 = vmatprep.subr.bf16.mxu1 %v6345_v31 }
 0x130   :  { %4016 = vmatpush3.bf16.msra.mxu0 %v6346_v23 }
 0x131   :  { %4018 = vmatprep.subr.bf16.mxu0 %v6348_v51 }
 0x132   :  { %3824 = vmatpush3.bf16.msra.mxu1 %v6345_v31 }
 0x133   :  { %3826 = vmatprep.subr.bf16.mxu1 %v6347_v0 }
 0x134   :  { %4020 = vmatpush3.bf16.msra.mxu0 %v6348_v51 }
 0x135   :  { %4022 = vmatprep.subr.bf16.mxu0 %v6349_v29 }
 0x136   :  { %3828 = vmatpush3.bf16.msra.mxu1 %v6347_v0 }
 0x137   :  { %3830 = vmatprep.subr.bf16.mxu1 %v5480_v43 }
 0x138   :  { %4024 = vmatpush3.bf16.msra.mxu0 %v6349_v29 }
 0x139   :  { %4026 = vmatprep.subr.bf16.mxu0 %v5523_v26 }
 0x13a   :  { %3832 = vmatpush3.bf16.msra.mxu1 %v5480_v43  ;;  %v6353_v43 = vld [vmem:[#allocation32_spill] sm:$0xff] }
 0x13b   :  { %3834 = vmatprep.subr.bf16.mxu1 %v5511_v52 }
 0x13c   :  { %4028 = vmatpush3.bf16.msra.mxu0 %v5523_v26 }
 0x13d   :  { %4030 = vmatprep.subr.bf16.mxu0 %v6351_v16 }
 0x13e   :  { %3836 = vmatpush3.bf16.msra.mxu1 %v5511_v52 }
 0x13f   :  { %3838 = vmatprep.subr.bf16.mxu1 %v6350_v28 }
 0x140   :  { %4032 = vmatpush3.bf16.msra.mxu0 %v6351_v16 }
 0x141   :  { %4034 = vmatprep.subr.bf16.mxu0 %v6353_v43 }
 0x142   :  { %3840 = vmatpush3.bf16.msra.mxu1 %v6350_v28 }
 0x143   :  { %3842 = vmatprep.subr.bf16.mxu1 %v6352_v37 }
 0x144   :  { %4036 = vmatpush3.bf16.msra.mxu0 %v6353_v43 }
 0x145   :  { %4038 = vmatprep.subr.msk.bf16.mxu0 %vm4794_vm1, %v6138_v53 }
 0x146   :  { %3844 = vmatpush3.bf16.msra.mxu1 %v6352_v37 }
 0x147   :  { %3846 = vmatprep.subr.msk.bf16.mxu1 %vm4780_vm0, %v6138_v53  ;;  %3450 = vmatmul.mubr.f32.vlgmr.msra.gmra.mrb[4].mxu0 %v6209_v58 }
 0x148   :  { %4040 = vmatpush3.bf16.msk.msra.mxu0 %vm4794_vm1, %v6138_v53  ;;  %3452 = vmatprep.mubr.f32.mxu0 %v4688_v18 }
 0x149   :  { %3222 = vmatmul.mubr.f32.vlgmr.msra.gmra.mrb[4].mxu1 %v5468_v33  ;;  %4042 = vmatprep.subr.msk.bf16.mxu0 %vm6253_vm5, %v6138_v53 }
 0x14a   :  { %3848 = vmatpush3.bf16.msk.msra.mxu1 %vm4780_vm0, %v6138_v53  ;;  %3224 = vmatprep.mubr.f32.mxu1 %v5494_v48 }
 0x14b   :  { %3850 = vmatprep.subr.msk.bf16.mxu1 %vm6251_vm4, %v6138_v53  ;;  %3453 = vmatmul.mubr.f32.gmra.mrb[6].mxu0 %v4707_v62 }
 0x14c   :  { %4044 = vmatpush3.bf16.msk.msra.mxu0 %vm6253_vm5, %v6138_v53  ;;  %3487 = vmatprep.mubr.f32.mxu0 %v6321_v50 }
 0x14d   :  { %3225 = vmatmul.mubr.f32.gmra.mrb[6].mxu1 %v5499_v61  ;;  %4046 = vmatprep.subr.msk.bf16.mxu0 %vm6261_vm14, %v6138_v53 }
 0x14e   :  { %3852 = vmatpush3.bf16.msk.msra.mxu1 %vm6251_vm4, %v6138_v53  ;;  %3259 = vmatprep.mubr.f32.mxu1 %v5115_v19 }
 0x14f   :  { %3854 = vmatprep.subr.msk.bf16.mxu1 %vm6259_vm8, %v6138_v53 }
 0x150   :  { %4048 = vmatpush3.bf16.msk.msra.mxu0 %vm6261_vm14, %v6138_v53 }
 0x151   :  { %4050 = vmatprep.subr.msk.bf16.mxu0 %vm6272_vm7, %v6138_v53 }
 0x152   :  { %3856 = vmatpush3.bf16.msk.msra.mxu1 %vm6259_vm8, %v6138_v53 }
 0x153   :  { %3858 = vmatprep.subr.msk.bf16.mxu1 %vm6270_vm3, %v6138_v53 }
 0x154   :  { %4052 = vmatpush3.bf16.msk.msra.mxu0 %vm6272_vm7, %v6138_v53 }
 0x155   :  { %4054 = vmatprep.subr.msk.bf16.mxu0 %vm6281_vm10, %v6138_v53 }
 0x156   :  { %3860 = vmatpush3.bf16.msk.msra.mxu1 %vm6270_vm3, %v6138_v53 }
 0x157   :  { %3862 = vmatprep.subr.msk.bf16.mxu1 %vm6279_vm9, %v6138_v53 }
 0x158   :  { %4056 = vmatpush3.bf16.msk.msra.mxu0 %vm6281_vm10, %v6138_v53 }
 0x159   :  { %4058 = vmatprep.subr.msk.bf16.mxu0 %vm6290_vm13, %v6138_v53 }
 0x15a   :  { %3864 = vmatpush3.bf16.msk.msra.mxu1 %vm6279_vm9, %v6138_v53 }
 0x15b   :  { %3866 = vmatprep.subr.msk.bf16.mxu1 %vm6288_vm11, %v6138_v53 }
 0x15c   :  { %4060 = vmatpush3.bf16.msk.msra.mxu0 %vm6290_vm13, %v6138_v53 }
 0x15d   :  { %4062 = vmatprep.subr.msk.bf16.mxu0 %vm6299_vm12, %v6138_v53 }
 0x15e   :  { %3868 = vmatpush3.bf16.msk.msra.mxu1 %vm6288_vm11, %v6138_v53 }
 0x15f   :  { %3870 = vmatprep.subr.msk.bf16.mxu1 %vm6297_vm6, %v6138_v53 }
 0x160   :  { %4064 = vmatpush3.bf16.msk.msra.mxu0 %vm6299_vm12, %v6138_v53 }
 0x161   :  { %4066 = vmatprep.subr.msk.bf16.mxu0 %vm5030_vm15, %v6138_v53 }
 0x162   :  { %3872 = vmatpush3.bf16.msk.msra.mxu1 %vm6297_vm6, %v6138_v53 }
 0x163   :  { %3874 = vmatprep.subr.msk.bf16.mxu1 %vm5014_vm2, %v6138_v53 }
 0x164   :  { %4068 = vmatpush3.bf16.msk.msra.mxu0 %vm5030_vm15, %v6138_v53 }
 0x166   :  { %3876 = vmatpush3.bf16.msk.msra.mxu1 %vm5014_vm2, %v6138_v53 }
 0x167   :  { %3488 = vmatmul.mubr.f32.vlgmr.msra.gmra.mrb[4].mxu0 %v6209_v58 }
 0x168   :  { %3490 = vmatprep.mubr.f32.mxu0 %v4688_v18 }
 0x169   :  { %3260 = vmatmul.mubr.f32.vlgmr.msra.gmra.mrb[4].mxu1 %v5468_v33 }
 0x16a   :  { %3262 = vmatprep.mubr.f32.mxu1 %v5494_v48 }
 0x16b   :  { %3491 = vmatmul.mubr.f32.gmra.mrb[6].mxu0 %v4707_v62 }
 0x16d   :  { %3263 = vmatmul.mubr.f32.gmra.mrb[6].mxu1 %v5499_v61 }
 0x175   :  { %v3033_v1 = vpop.f32.mrb[0].mxu0 }
 0x176   :  { %v774_v55 = vpop.f32.mrb[1].mxu0 }
 0x178   :  { %v2919_v19 = vpop.f32.mrb[0].mxu1 }
 0x179   :  { %v4069_v25 = vadd.f32 %v3033_v1, %v2919_v19  ;;  %v464_v30 = vpop.f32.mrb[1].mxu1  ;;  %v3036_v33 = vpop.f32.mrb[2].mxu0 }
 0x17a   :  { %v4070_v42 = vadd.f32 %v774_v55, %v464_v30  ;;  %v786_v9 = vpop.f32.mrb[3].mxu0 }
 0x17b   :  { %v2219_v7 = vmul.f32 %v4069_v25, %v4069_v25 }
 0x17c   :  { %v2218_v53 = vmul.f32 %v4070_v42, %v4070_v42 }
 0x17e   :  { %v2922_v26 = vpop.f32.mrb[2].mxu1  ;;  %v2222_v48 = vadd.f32 %v2219_v7, %v2218_v53 }
 0x17f   :  { %v4071_v14 = vadd.f32 %v3036_v33, %v2922_v26  ;;  %v478_v58 = vpop.f32.mrb[3].mxu1 }
 0x180   :  { %v4072_v47 = vadd.f32 %v786_v9, %v478_v58 }
 0x181   :  { %v2221_v24 = vmul.f32 %v4071_v14, %v4071_v14 }
 0x182   :  { %v2220_v18 = vmul.f32 %v4072_v47, %v4072_v47 }
 0x184   :  { %v2223_v61 = vadd.f32 %v2222_v48, %v2220_v18 }
 0x186   :  { %v2224_v52 = vadd.f32 %v2223_v61, %v2221_v24 }
 0x188   :  { %v2225_v62 = vrot.slane %v2224_v52, 4 }
 0x18a   :  { %v2226_v2 = vadd.f32 %v2225_v62, %v2224_v52 }
 0x18c   :  { %v2227_v27 = vrot.slane %v2226_v2, 2 }
 0x18e   :  { %v2228_v15 = vadd.f32 %v2227_v27, %v2226_v2 }
 0x190   :  { %v2229_v60 = vrot.slane %v2228_v15, 1 }
 0x192   :  { %v2230_v39 = vadd.f32 %v2229_v60, %v2228_v15 }
 0x194   :  { %v2231_v38 = vmax.f32 %v2230_v39, 1e-24 }
 0x196   :  { %4137 = vrsqrt.f32 %v2231_v38 }
 0x1a0   :  { %v4138_v59 = vpop.eup %4137 }
 0x1a1   :  { %v2234_v22 = vmul.f32 %v4138_v59, %v4069_v25  ;;  %v2233_v10 = vmul.f32 %v4138_v59, %v4070_v42  ;;  %v2236_v54 = vmul.f32 %v4138_v59, %v4071_v14  ;;  %v2235_v36 = vmul.f32 %v4138_v59, %v4072_v47 }
 0x23a   :  { %v3489_v63 = vpop.f32.mrb[4].mxu0 }
 0x23b   :  { %v2238_v44 = vmul.f32 %v3489_v63, %v3489_v63  ;;  %v2196_v57 = vpop.f32.mrb[5].mxu0 }
 0x23c   :  { %v3261_v50 = vpop.f32.mrb[4].mxu1  ;;  %v2237_v45 = vmul.f32 %v2196_v57, %v2196_v57 }
 0x23d   :  { %v2257_v49 = vadd.f32 %v3261_v50, %v2234_v22  ;;  %v1485_v35 = vpop.f32.mrb[5].mxu1 }
 0x23e   :  { %v2256_v12 = vadd.f32 %v2233_v10, %v1485_v35  ;;  %v2241_v17 = vadd.f32 %v2238_v44, %v2237_v45  ;;  %v3492_v20 = vpop.f32.mrb[6].mxu0 }
 0x23f   :  { %v2208_v8 = vpop.f32.mrb[7].mxu0  ;;  %v2240_v6 = vmul.f32 %v3492_v20, %v3492_v20 }
 0x240   :  { %v3264_v56 = vpop.f32.mrb[6].mxu1  ;;  %v2239_v34 = vmul.f32 %v2208_v8, %v2208_v8 }
 0x241   :  { %v2259_v3 = vadd.f32 %v3264_v56, %v2236_v54  ;;  %v1497_v11 = vpop.f32.mrb[7].mxu1 }
 0x242   :  { %v2258_v13 = vadd.f32 %v2235_v36, %v1497_v11  ;;  %v2242_v46 = vadd.f32 %v2241_v17, %v2239_v34 }
 0x244   :  { %v2243_v40 = vadd.f32 %v2242_v46, %v2240_v6 }
 0x246   :  { %v2244_v32 = vrot.slane %v2243_v40, 4 }
 0x248   :  { %v2245_v4 = vadd.f32 %v2244_v32, %v2243_v40 }
 0x24a   :  { %v2246_v5 = vrot.slane %v2245_v4, 2 }
 0x24c   :  { %v2247_v21 = vadd.f32 %v2246_v5, %v2245_v4 }
 0x24e   :  { %v2248_v41 = vrot.slane %v2247_v21, 1 }
 0x250   :  { %v2249_v31 = vadd.f32 %v2248_v41, %v2247_v21 }
 0x252   :  { %v2250_v23 = vmax.f32 %v2249_v31, 1e-24 }
 0x254   :  { %4139 = vrsqrt.f32 %v2250_v23 }
 0x25e   :  { %v4140_v0 = vpop.eup %4139 }
 0x25f   :  { %v2252_v51 = vmul.f32 %v4140_v0, %v2196_v57  ;;  %v2253_v29 = vmul.f32 %v4140_v0, %v3489_v63  ;;  %v2254_v28 = vmul.f32 %v4140_v0, %v2208_v8  ;;  %v2255_v16 = vmul.f32 %v4140_v0, %v3492_v20 }
 0x261   :  { %v2260_v37 = vsub.f32 %v2256_v12, %v2252_v51  ;;  %v2261_v43 = vsub.f32 %v2257_v49, %v2253_v29  ;;  %v2262_v19 = vsub.f32 %v2258_v13, %v2254_v28  ;;  %v2263_v1 = vsub.f32 %v2259_v3, %v2255_v16 }
 0x263   :  { %v2264_v25 = vmul.f32 %v2260_v37, %v2260_v37  ;;  %v2265_v30 = vmul.f32 %v2261_v43, %v2261_v43  ;;  %v2266_v55 = vmul.f32 %v2262_v19, %v2262_v19  ;;  %v2267_v7 = vmul.f32 %v2263_v1, %v2263_v1 }
 0x265   :  { %v2268_v42 = vadd.f32 %v2265_v30, %v2264_v25 }
 0x267   :  { %v2269_v53 = vadd.f32 %v2268_v42, %v2266_v55 }
 0x269   :  { %v2270_v26 = vadd.f32 %v2269_v53, %v2267_v7 }
 0x26b   :  { %v2271_v33 = vrot.slane %v2270_v26, 4 }
 0x26d   :  { %v2272_v14 = vadd.f32 %v2271_v33, %v2270_v26 }
 0x26f   :  { %v2273_v58 = vrot.slane %v2272_v14, 2 }
 0x271   :  { %v2274_v9 = vadd.f32 %v2273_v58, %v2272_v14 }
 0x273   :  { %v2275_v48 = vrot.slane %v2274_v9, 1 }
 0x275   :  { %v2276_v47 = vadd.f32 %v2275_v48, %v2274_v9 }
 0x277   :  { %4141 = vrsqrt.f32 %v2276_v47  ;;  %vm2279_vm0 = vcmp.eq.f32.partialorder %v2276_v47, inf  ;;  %v2282_v61 = vand.u32 2147483648, %v2276_v47  ;;  %vm2281_vm1 = vcmp.eq.f32.partialorder %v2276_v47, 0.0 }
 0x281   :  { %v4142_v18 = vpop.eup %4141 }
 0x282   :  { %v2278_v24 = vmul.f32 %v4142_v18, %v2276_v47 }
 0x284   :  { %v2280_v52 = vsel %vm2279_vm0, %v2276_v47, %v2278_v24 }
 0x285   :  { %v2283_v62 = vsel %vm2281_vm1, %v2282_v61, %v2280_v52 }
 0x286   :  { %v2284_v2 = vsub.f32 0.0, %v2283_v62 }
 0x288   :  { %2285 = vst [vmem:[#allocation8] sm:$0x1] %v2284_v2 }
 0x289   :  { %4220 = shalt.err (!%p4217_p0)
}
 0x28a   :  { %s4221_s12 = scalar_lea.hbm %s5949_s5, 16 }
 0x28b   :  { %p4222_p1 = scmp.ne.s32.totalorder %s5949_s5, %s4221_s12  ;;  %p4225_p2 = scmp.lt.u32.totalorder %s4221_s12, %s5949_s5 }
 0x28d   :  { %p4227_p3 = pnand %p4225_p2, %p4222_p1 }
 0x28f   :  { %4230 = shalt.err (!%p4227_p3)
}
 0x290   :  { %2295 = dma.vmem_to_hbm [thread:$0]  %s2293_s2, 16, %s5949_s5, [#allocation4]  }
 0x291   :  { %4235 = dma.done.wait [#allocation4], 16  }
 0x292   :  { %4236 = vsyncadd [#allocation4], 4294967280 }
 0x293   :  { %2299 = vsyncpa [#allocation3], 1 }
 0x294   :  { %2300 = vsyncpa [#allocation6], 1 }
 0x295   :  { %2301 = vsyncpa [#allocation4], 1 }

</bundles_post_ra>
